<compile_context>
chip_gen: v7x
topology: tpu7x:2x2x1
jax: 0.10.0
libtpu: 0.0.40
codegen_flags: <defaults>
</compile_context>

<pallas_src>
import functools

import jax
import jax.numpy as jnp
from jax import lax
from jax.experimental import pallas as pl
from jax.experimental.pallas import tpu as pltpu


_LANE = 128    # lane width: pad H and O to multiples of this
_CHUNK = 8     # timesteps per grid iteration (sublane-dense hidden-state tile)


def _round_up(x, m):
    return (x + m - 1) // m * m


# --------------------------- Phase 1: LSTM recurrence ---------------------------

def _lstm_recurrence_kernel(T, C, Hp,
                            tok_ref,    # SMEM (T_pad,) int32  -- prefetched token ids
                            emb_ref,    # VMEM (Op, Hp)        -- padded embedding table
                            w_ih_ref,   # VMEM (Hp, 4*Hp)      -- padded w_ih^T
                            w_hh_ref,   # VMEM (Hp, 4*Hp)      -- padded w_hh^T
                            b_ref,      # VMEM (1, 4*Hp)       -- padded b_ih + b_hh
                            h0_ref,     # VMEM (1, Hp)
                            c0_ref,     # VMEM (1, Hp)
                            hs_ref,     # VMEM (C, Hp)   out   -- hidden states of chunk
                            h_out_ref,  # VMEM (1, Hp)   out   -- final hidden
                            c_out_ref,  # VMEM (1, Hp)   out   -- final cell
                            h_sc,       # VMEM (1, Hp)   scratch carry
                            c_sc):      # VMEM (1, Hp)   scratch carry
    chunk = pl.program_id(0)

    @pl.when(chunk == 0)
    def _():
        h_sc[...] = h0_ref[...]
        c_sc[...] = c0_ref[...]

    h = h_sc[...]
    c = c_sc[...]
    need_mask = (T % C) != 0  # static: only mask when T is not a multiple of C

    rows = []
    for i in range(C):                      # short fixed trip count -> fully unrolled
        t = chunk * C + i
        tok = tok_ref[t]
        # In-kernel embedding row gather (dynamic sublane slice) + ReLU.
        x = jnp.maximum(emb_ref[pl.ds(tok, 1), :], 0.0)               # (1, Hp)

        # Fused-bias gates, PyTorch order (i, f, g, o); two accumulating MXU dots.
        gates = (jnp.dot(x, w_ih_ref[...], preferred_element_type=jnp.float32)
                 + jnp.dot(h, w_hh_ref[...], preferred_element_type=jnp.float32)
                 + b_ref[...])                                        # (1, 4*Hp)

        i_g = jax.nn.sigmoid(gates[:, 0 * Hp:1 * Hp])
        f_g = jax.nn.sigmoid(gates[:, 1 * Hp:2 * Hp])
        g_g = jnp.tanh(gates[:, 2 * Hp:3 * Hp])
        o_g = jax.nn.sigmoid(gates[:, 3 * Hp:4 * Hp])

        c_new = f_g * c + i_g * g_g
        h_new = o_g * jnp.tanh(c_new)

        if need_mask:
            valid = t < T
            h_new = jnp.where(valid, h_new, h)
            c_new = jnp.where(valid, c_new, c)

        h, c = h_new, c_new
        rows.append(h)

    hs_ref[...] = jnp.concatenate(rows, axis=0)   # one dense (C, Hp) tile store
    h_sc[...] = h
    c_sc[...] = c
    h_out_ref[...] = h
    c_out_ref[...] = c


# ------------------- Phase 2: batched projection + log_softmax -------------------

def _projection_kernel(O,
                       hs_ref,    # VMEM (TM, Hp)
                       w_ref,     # VMEM (Hp, Op)  -- padded w_out^T
                       b_ref,     # VMEM (1, Op)
                       out_ref):  # VMEM (TM, Op)  -- log-probs (padded cols = -inf)
    logits = (jnp.dot(hs_ref[...], w_ref[...], preferred_element_type=jnp.float32)
              + b_ref[...])                                           # (TM, Op)
    col = lax.broadcasted_iota(jnp.int32, logits.shape, 1)
    logits = jnp.where(col < O, logits, -jnp.inf)                     # mask pad columns
    m = jnp.max(logits, axis=1, keepdims=True)
    lse = m + jnp.log(jnp.sum(jnp.exp(logits - m), axis=1, keepdims=True))
    out_ref[...] = logits - lse


# --------------------------------- weight prep -----------------------------------

def prepare_params(raw):
    """One-time weight prep: transposes, bias fold, and 128-lane padding."""
    emb = jnp.asarray(raw["emb"], jnp.float32)
    O, H = emb.shape
    Hp = _round_up(H, _LANE)
    Op = _round_up(O, _LANE)

    emb_p = jnp.zeros((Op, Hp), jnp.float32).at[:O, :H].set(emb)

    w_ih_t = jnp.asarray(raw["w_ih"], jnp.float32).T        # (H, 4H)
    w_hh_t = jnp.asarray(raw["w_hh"], jnp.float32).T        # (H, 4H)
    b = jnp.asarray(raw["b_ih"], jnp.float32) + jnp.asarray(raw["b_hh"], jnp.float32)

    # Place each gate's H columns at lane-aligned offsets g*Hp so gate slices in the
    # kernel are whole vregs; pad weights/bias are zero so padded h/c lanes stay 0.
    w_ih_p = jnp.zeros((Hp, 4 * Hp), jnp.float32)
    w_hh_p = jnp.zeros((Hp, 4 * Hp), jnp.float32)
    b_p = jnp.zeros((1, 4 * Hp), jnp.float32)
    for g in range(4):
        w_ih_p = w_ih_p.at[:H, g * Hp:g * Hp + H].set(w_ih_t[:, g * H:(g + 1) * H])
        w_hh_p = w_hh_p.at[:H, g * Hp:g * Hp + H].set(w_hh_t[:, g * H:(g + 1) * H])
        b_p = b_p.at[0, g * Hp:g * Hp + H].set(b[g * H:(g + 1) * H])

    w_out_p = jnp.zeros((Hp, Op), jnp.float32).at[:H, :O].set(
        jnp.asarray(raw["w_out"], jnp.float32).T)
    b_out_p = jnp.zeros((1, Op), jnp.float32).at[0, :O].set(
        jnp.asarray(raw["b_out"], jnp.float32))

    # TODO(synk): for realistic vocab sizes on v7x, cast weights to bf16 and tile w_out
    # over O with an online log_softmax instead of keeping the full (Hp, Op) resident.
    return {
        "hidden_size": H, "output_size": O, "Hp": Hp, "Op": Op,
        "emb": emb_p, "w_ih_t": w_ih_p, "w_hh_t": w_hh_p, "b": b_p,
        "w_out_t": w_out_p, "b_out": b_out_p,
    }


def _split_and_pad_hidden(hidden, H, Hp):
    if isinstance(hidden, tuple):
        h0, c0 = hidden
    else:
        # PyTorch branch: cell state defaults to zeros.
        h0, c0 = hidden, jnp.zeros_like(hidden)
    h0 = jnp.asarray(h0, jnp.float32).reshape(1, H)
    c0 = jnp.asarray(c0, jnp.float32).reshape(1, H)
    pad = Hp - H
    if pad:
        h0 = jnp.pad(h0, ((0, 0), (0, pad)))
        c0 = jnp.pad(c0, ((0, 0), (0, pad)))
    return h0, c0


# ------------------------------------ wrappers ------------------------------------

def decoder_bilstm_decode(prepared, tokens, hidden):
    """Fused T-step (teacher-forced) decode.

    tokens : int (T,) token ids.
    hidden : (h0, c0) of shape (1,1,H) each, or a single (1,1,H) array (c0 = 0).
    Returns (log_probs (T, O), (h_T (1,1,H), c_T (1,1,H))). Each step reproduces
    DecoderbiLSTM.forward exactly.
    """
    H, O = prepared["hidden_size"], prepared["output_size"]
    Hp, Op = prepared["Hp"], prepared["Op"]
    T = int(tokens.shape[0])
    C = _CHUNK
    T_pad = _round_up(T, C)

    h0, c0 = _split_and_pad_hidden(hidden, H, Hp)

    toks = jnp.clip(tokens.astype(jnp.int32), 0, O - 1)
    if T_pad != T:
        toks = jnp.concatenate([toks, jnp.zeros((T_pad - T,), jnp.int32)])

    const = lambda shape: pl.BlockSpec(shape, lambda i, tok: (0,) * len(shape))

    # ---- Phase 1: serial recurrence, chunked over timesteps ----
    rec_spec = pltpu.PrefetchScalarGridSpec(
        num_scalar_prefetch=1,
        grid=(T_pad // C,),
        in_specs=[
            const((Op, Hp)),          # embedding table (VMEM-resident across chunks)
            const((Hp, 4 * Hp)),      # w_ih^T
            const((Hp, 4 * Hp)),      # w_hh^T
            const((1, 4 * Hp)),       # fused bias
            const((1, Hp)),           # h0
            const((1, Hp)),           # c0
        ],
        out_specs=[
            pl.BlockSpec((C, Hp), lambda i, tok: (i, 0)),   # hidden states per chunk
            const((1, Hp)),                                 # final h
            const((1, Hp)),                                 # final c
        ],
        scratch_shapes=[pltpu.VMEM((1, Hp), jnp.float32),
                        pltpu.VMEM((1, Hp), jnp.float32)],
    )
    hs, hT, cT = pl.pallas_call(
        functools.partial(_lstm_recurrence_kernel, T, C, Hp),
        out_shape=(jax.ShapeDtypeStruct((T_pad, Hp), jnp.float32),
                   jax.ShapeDtypeStruct((1, Hp), jnp.float32),
                   jax.ShapeDtypeStruct((1, Hp), jnp.float32)),
        grid_spec=rec_spec,
        compiler_params=pltpu.CompilerParams(
            dimension_semantics=("arbitrary",)),   # timesteps are sequentially dependent
    )(toks, prepared["emb"], prepared["w_ih_t"], prepared["w_hh_t"], prepared["b"],
      h0, c0)

    # ---- Phase 2: batched projection + log_softmax over T-row tiles ----
    TM = 128 if T_pad % 128 == 0 else C
    proj_spec = pltpu.PrefetchScalarGridSpec(
        num_scalar_prefetch=0,
        grid=(T_pad // TM,),
        in_specs=[
            pl.BlockSpec((TM, Hp), lambda i: (i, 0)),
            pl.BlockSpec((Hp, Op), lambda i: (0, 0)),
            pl.BlockSpec((1, Op), lambda i: (0, 0)),
        ],
        out_specs=pl.BlockSpec((TM, Op), lambda i: (i, 0)),
    )
    logp = pl.pallas_call(
        functools.partial(_projection_kernel, O),
        out_shape=jax.ShapeDtypeStruct((T_pad, Op), jnp.float32),
        grid_spec=proj_spec,
        compiler_params=pltpu.CompilerParams(
            dimension_semantics=("parallel",)),    # independent row tiles (2 TCs on v7x)
    )(hs, prepared["w_out_t"], prepared["b_out"])

    logp = logp[:T, :O]
    return logp, (hT[:, :H].reshape(1, 1, H), cT[:, :H].reshape(1, 1, H))


def decoder_bilstm_forward(prepared, token, hidden):
    """Exact single-step equivalent of DecoderbiLSTM.forward (T = 1)."""
    logp, hid = decoder_bilstm_decode(prepared, token.reshape(1), hidden)
    return logp, hid   # logp has shape (1, O)


# ----------------------------- reference & test ------------------------------

def init_params(key, hidden_size, output_size):
    ks = jax.random.split(key, 7)
    s = 0.1
    return {
        "emb":   (s * jax.random.normal(ks[0], (output_size, hidden_size))).astype(jnp.float32),
        "w_ih":  (s * jax.random.normal(ks[1], (4 * hidden_size, hidden_size))).astype(jnp.float32),
        "w_hh":  (s * jax.random.normal(ks[2], (4 * hidden_size, hidden_size))).astype(jnp.float32),
        "b_ih":  (s * jax.random.normal(ks[3], (4 * hidden_size,))).astype(jnp.float32),
        "b_hh":  (s * jax.random.normal(ks[4], (4 * hidden_size,))).astype(jnp.float32),
        "w_out": (s * jax.random.normal(ks[5], (output_size, hidden_size))).astype(jnp.float32),
        "b_out": (s * jax.random.normal(ks[6], (output_size,))).astype(jnp.float32),
    }


def _reference_forward(params, token, hidden):
    """Pure-JAX reference (mirrors the PyTorch module exactly)."""
    if isinstance(hidden, tuple):
        h0, c0 = hidden
    else:
        h0, c0 = hidden, jnp.zeros_like(hidden)
    H = params["emb"].shape[1]
    x = jnp.maximum(params["emb"][token[0]].reshape(1, H), 0.0)
    gates = (x @ params["w_ih"].T + h0.reshape(1, H) @ params["w_hh"].T
             + params["b_ih"] + params["b_hh"])
    i_g = jax.nn.sigmoid(gates[:, 0 * H:1 * H])
    f_g = jax.nn.sigmoid(gates[:, 1 * H:2 * H])
    g_g = jnp.tanh(gates[:, 2 * H:3 * H])
    o_g = jax.nn.sigmoid(gates[:, 3 * H:4 * H])
    c = f_g * c0.reshape(1, H) + i_g * g_g
    h = o_g * jnp.tanh(c)
    logits = h @ params["w_out"].T + params["b_out"]
    return jax.nn.log_softmax(logits, axis=1), (h, c)


def _reference_decode(params, tokens, hidden):
    logps = []
    hid = hidden
    for t in range(tokens.shape[0]):
        lp, hid = _reference_forward(params, tokens[t:t + 1], hid)
        logps.append(lp)
    return jnp.concatenate(logps, axis=0), hid


if __name__ == "__main__":
    hidden_size = 32
    output_size = 64
    T = 8

    key = jax.random.PRNGKey(0)
    pkey, tkey = jax.random.split(key)
    raw_params = init_params(pkey, hidden_size, output_size)
    prepared = prepare_params(raw_params)          # one-time weight prep

    tokens = jax.random.randint(tkey, (T,), 0, output_size, dtype=jnp.int32)
    h0 = jnp.zeros((1, 1, hidden_size), jnp.float32)   # initHidden(); non-tuple branch

    # --- single-step forward (matches the PyTorch module call) ---------------
    logp1, (h1, c1) = decoder_bilstm_forward(prepared, tokens[:1], h0)
    jax.block_until_ready((logp1, h1, c1))

    ref_logp1, (ref_h1, ref_c1) = _reference_forward(raw_params, tokens[:1], h0)
    assert logp1.shape == (1, output_size)
    assert jnp.allclose(logp1, ref_logp1, atol=1e-4)
    assert jnp.allclose(h1.reshape(1, hidden_size), ref_h1, atol=1e-4)
    assert jnp.allclose(c1.reshape(1, hidden_size), ref_c1, atol=1e-4)

    # --- fused multi-step decode (weights resident, h/c carried in VMEM) -----
    logps, (hT, cT) = decoder_bilstm_decode(prepared, tokens, h0)
    jax.block_until_ready((logps, hT, cT))

    ref_logps, (ref_hT, ref_cT) = _reference_decode(raw_params, tokens, h0)
    assert logps.shape == (T, output_size)
    assert jnp.allclose(logps, ref_logps, atol=1e-4)
    assert jnp.allclose(hT.reshape(1, hidden_size),
                        ref_hT.reshape(1, hidden_size), atol=1e-4)
    assert jnp.allclose(cT.reshape(1, hidden_size),
                        ref_cT.reshape(1, hidden_size), atol=1e-4)

    print("KERNEL_OK")
</pallas_src>

<mosaic_0001>
module attributes {stable_mosaic.version = 11 : i64} {
  func.func @_lstm_recurrence_kernel(%arg0: i32, %arg1: memref<8xi32, #tpu.memory_space<smem>>, %arg2: memref<128x128xf32, #tpu.memory_space<vmem>>, %arg3: memref<128x512xf32, #tpu.memory_space<vmem>>, %arg4: memref<128x512xf32, #tpu.memory_space<vmem>>, %arg5: memref<1x512xf32, #tpu.memory_space<vmem>>, %arg6: memref<1x128xf32, #tpu.memory_space<vmem>>, %arg7: memref<1x128xf32, #tpu.memory_space<vmem>>, %arg8: memref<8x128xf32, #tpu.memory_space<vmem>>, %arg9: memref<1x128xf32, #tpu.memory_space<vmem>>, %arg10: memref<1x128xf32, #tpu.memory_space<vmem>>, %arg11: memref<1x128xf32, #tpu.memory_space<vmem>>, %arg12: memref<1x128xf32, #tpu.memory_space<vmem>>) attributes {dimension_semantics = [#tpu.dimension_semantics<arbitrary>], iteration_bounds = array<i64: 1>, scalar_prefetch = 1 : i64, scratch_operands = 2 : i64, tpu.core_type = #tpu.core_type<tc>, window_params = [{pipeline_mode = #tpu.pipeline_mode<synchronous>, transform_indices = @transform_0, window_bounds = array<i64: 128, 128>}, {pipeline_mode = #tpu.pipeline_mode<synchronous>, transform_indices = @transform_1, window_bounds = array<i64: 128, 512>}, {pipeline_mode = #tpu.pipeline_mode<synchronous>, transform_indices = @transform_2, window_bounds = array<i64: 128, 512>}, {pipeline_mode = #tpu.pipeline_mode<synchronous>, transform_indices = @transform_3, window_bounds = array<i64: 1, 512>}, {pipeline_mode = #tpu.pipeline_mode<synchronous>, transform_indices = @transform_4, window_bounds = array<i64: 1, 128>}, {pipeline_mode = #tpu.pipeline_mode<synchronous>, transform_indices = @transform_5, window_bounds = array<i64: 1, 128>}, {transform_indices = @transform_6, window_bounds = array<i64: 8, 128>}, {pipeline_mode = #tpu.pipeline_mode<synchronous>, transform_indices = @transform_7, window_bounds = array<i64: 1, 128>}, {pipeline_mode = #tpu.pipeline_mode<synchronous>, transform_indices = @transform_8, window_bounds = array<i64: 1, 128>}]} {
    %c0_i32 = arith.constant 0 : i32
    %0 = arith.cmpi eq, %arg0, %c0_i32 : i32
    %1 = arith.extui %0 : i1 to i32
    %c0_i32_0 = arith.constant 0 : i32
    %2 = arith.cmpi ne, %1, %c0_i32_0 : i32
    scf.if %2 {
      %c0_133 = arith.constant 0 : index
      %c0_134 = arith.constant 0 : index
      %355 = vector.load %arg6[%c0_133, %c0_134] : memref<1x128xf32, #tpu.memory_space<vmem>>, vector<1x128xf32>
      %c0_135 = arith.constant 0 : index
      %c0_136 = arith.constant 0 : index
      %356 = vector.load %arg11[%c0_135, %c0_136] : memref<1x128xf32, #tpu.memory_space<vmem>>, vector<1x128xf32>
      tpu.vector_store %arg11[%c0_135, %c0_136], %355 {strides = array<i32>} : memref<1x128xf32, #tpu.memory_space<vmem>>, vector<1x128xf32>,
      %c0_137 = arith.constant 0 : index
      %c0_138 = arith.constant 0 : index
      %357 = vector.load %arg7[%c0_137, %c0_138] : memref<1x128xf32, #tpu.memory_space<vmem>>, vector<1x128xf32>
      %c0_139 = arith.constant 0 : index
      %c0_140 = arith.constant 0 : index
      %358 = vector.load %arg12[%c0_139, %c0_140] : memref<1x128xf32, #tpu.memory_space<vmem>>, vector<1x128xf32>
      tpu.vector_store %arg12[%c0_139, %c0_140], %357 {strides = array<i32>} : memref<1x128xf32, #tpu.memory_space<vmem>>, vector<1x128xf32>,
    } else {
    }
    %c0 = arith.constant 0 : index
    %c0_1 = arith.constant 0 : index
    %3 = vector.load %arg11[%c0, %c0_1] : memref<1x128xf32, #tpu.memory_space<vmem>>, vector<1x128xf32>
    %c0_2 = arith.constant 0 : index
    %c0_3 = arith.constant 0 : index
    %4 = vector.load %arg12[%c0_2, %c0_3] : memref<1x128xf32, #tpu.memory_space<vmem>>, vector<1x128xf32>
    %c8_i32 = arith.constant 8 : i32
    %5 = arith.muli %arg0, %c8_i32 : i32
    %c0_i32_4 = arith.constant 0 : i32
    %6 = arith.addi %5, %c0_i32_4 : i32
    %7 = arith.index_cast %6 : i32 to index
    %8 = memref.load %arg1[%7] : memref<8xi32, #tpu.memory_space<smem>>
    %9 = arith.index_cast %8 : i32 to index
    %c0_5 = arith.constant 0 : index
    %10 = vector.load %arg2[%9, %c0_5] : memref<128x128xf32, #tpu.memory_space<vmem>>, vector<1x128xf32>
    %cst = arith.constant 0.000000e+00 : f32
    %11 = vector.broadcast %cst : f32 to vector<1x128xf32>
    %12 = arith.maximumf %10, %11 : vector<1x128xf32>
    %c0_6 = arith.constant 0 : index
    %c0_7 = arith.constant 0 : index
    %13 = vector.load %arg3[%c0_6, %c0_7] : memref<128x512xf32, #tpu.memory_space<vmem>>, vector<128x512xf32>
    %cst_8 = arith.constant dense<0.000000e+00> : vector<1x512xf32>
    %14 = tpu.matmul %12, %13, %cst_8 {dimension_numbers = #tpu.dot_dimension_numbers<[1], [0], [0], [1], [0, 0, 1, 1], [], []>} : vector<1x128xf32>, vector<128x512xf32>, vector<1x512xf32> -> vector<1x512xf32>
    %c0_9 = arith.constant 0 : index
    %c0_10 = arith.constant 0 : index
    %15 = vector.load %arg4[%c0_9, %c0_10] : memref<128x512xf32, #tpu.memory_space<vmem>>, vector<128x512xf32>
    %cst_11 = arith.constant dense<0.000000e+00> : vector<1x512xf32>
    %16 = tpu.matmul %3, %15, %cst_11 {dimension_numbers = #tpu.dot_dimension_numbers<[1], [0], [0], [1], [0, 0, 1, 1], [], []>} : vector<1x128xf32>, vector<128x512xf32>, vector<1x512xf32> -> vector<1x512xf32>
    %17 = arith.addf %14, %16 : vector<1x512xf32>
    %c0_12 = arith.constant 0 : index
    %c0_13 = arith.constant 0 : index
    %18 = vector.load %arg5[%c0_12, %c0_13] : memref<1x512xf32, #tpu.memory_space<vmem>>, vector<1x512xf32>
    %19 = arith.addf %17, %18 : vector<1x512xf32>
    %20 = vector.extract_strided_slice %19 {offsets = [0, 0], sizes = [1, 128], strides = [1, 1]} : vector<1x512xf32> to vector<1x128xf32>
    %21 = arith.negf %20 : vector<1x128xf32>
    %22 = math.exp %21 : vector<1x128xf32>
    %cst_14 = arith.constant 1.000000e+00 : f32
    %23 = vector.broadcast %cst_14 : f32 to vector<1x128xf32>
    %24 = arith.addf %23, %22 : vector<1x128xf32>
    %25 = arith.divf %23, %24 : vector<1x128xf32>
    %26 = vector.extract_strided_slice %19 {offsets = [0, 128], sizes = [1, 128], strides = [1, 1]} : vector<1x512xf32> to vector<1x128xf32>
    %27 = arith.negf %26 : vector<1x128xf32>
    %28 = math.exp %27 : vector<1x128xf32>
    %cst_15 = arith.constant 1.000000e+00 : f32
    %29 = vector.broadcast %cst_15 : f32 to vector<1x128xf32>
    %30 = arith.addf %29, %28 : vector<1x128xf32>
    %31 = arith.divf %29, %30 : vector<1x128xf32>
    %32 = vector.extract_strided_slice %19 {offsets = [0, 256], sizes = [1, 128], strides = [1, 1]} : vector<1x512xf32> to vector<1x128xf32>
    %33 = math.tanh %32 : vector<1x128xf32>
    %34 = vector.extract_strided_slice %19 {offsets = [0, 384], sizes = [1, 128], strides = [1, 1]} : vector<1x512xf32> to vector<1x128xf32>
    %35 = arith.negf %34 : vector<1x128xf32>
    %36 = math.exp %35 : vector<1x128xf32>
    %cst_16 = arith.constant 1.000000e+00 : f32
    %37 = vector.broadcast %cst_16 : f32 to vector<1x128xf32>
    %38 = arith.addf %37, %36 : vector<1x128xf32>
    %39 = arith.divf %37, %38 : vector<1x128xf32>
    %40 = arith.mulf %31, %4 : vector<1x128xf32>
    %41 = arith.mulf %25, %33 : vector<1x128xf32>
    %42 = arith.addf %40, %41 : vector<1x128xf32>
    %43 = math.tanh %42 : vector<1x128xf32>
    %44 = arith.mulf %39, %43 : vector<1x128xf32>
    %c1_i32 = arith.constant 1 : i32
    %45 = arith.cmpi slt, %6, %c1_i32 : i32
    %46 = arith.select %45, %44, %3 : vector<1x128xf32>
    %47 = arith.select %45, %42, %4 : vector<1x128xf32>
    %c8_i32_17 = arith.constant 8 : i32
    %48 = arith.muli %arg0, %c8_i32_17 : i32
    %c1_i32_18 = arith.constant 1 : i32
    %49 = arith.addi %48, %c1_i32_18 : i32
    %50 = arith.index_cast %49 : i32 to index
    %51 = memref.load %arg1[%50] : memref<8xi32, #tpu.memory_space<smem>>
    %52 = arith.index_cast %51 : i32 to index
    %c0_19 = arith.constant 0 : index
    %53 = vector.load %arg2[%52, %c0_19] : memref<128x128xf32, #tpu.memory_space<vmem>>, vector<1x128xf32>
    %cst_20 = arith.constant 0.000000e+00 : f32
    %54 = vector.broadcast %cst_20 : f32 to vector<1x128xf32>
    %55 = arith.maximumf %53, %54 : vector<1x128xf32>
    %c0_21 = arith.constant 0 : index
    %c0_22 = arith.constant 0 : index
    %56 = vector.load %arg3[%c0_21, %c0_22] : memref<128x512xf32, #tpu.memory_space<vmem>>, vector<128x512xf32>
    %cst_23 = arith.constant dense<0.000000e+00> : vector<1x512xf32>
    %57 = tpu.matmul %55, %56, %cst_23 {dimension_numbers = #tpu.dot_dimension_numbers<[1], [0], [0], [1], [0, 0, 1, 1], [], []>} : vector<1x128xf32>, vector<128x512xf32>, vector<1x512xf32> -> vector<1x512xf32>
    %c0_24 = arith.constant 0 : index
    %c0_25 = arith.constant 0 : index
    %58 = vector.load %arg4[%c0_24, %c0_25] : memref<128x512xf32, #tpu.memory_space<vmem>>, vector<128x512xf32>
    %cst_26 = arith.constant dense<0.000000e+00> : vector<1x512xf32>
    %59 = tpu.matmul %46, %58, %cst_26 {dimension_numbers = #tpu.dot_dimension_numbers<[1], [0], [0], [1], [0, 0, 1, 1], [], []>} : vector<1x128xf32>, vector<128x512xf32>, vector<1x512xf32> -> vector<1x512xf32>
    %60 = arith.addf %57, %59 : vector<1x512xf32>
    %c0_27 = arith.constant 0 : index
    %c0_28 = arith.constant 0 : index
    %61 = vector.load %arg5[%c0_27, %c0_28] : memref<1x512xf32, #tpu.memory_space<vmem>>, vector<1x512xf32>
    %62 = arith.addf %60, %61 : vector<1x512xf32>
    %63 = vector.extract_strided_slice %62 {offsets = [0, 0], sizes = [1, 128], strides = [1, 1]} : vector<1x512xf32> to vector<1x128xf32>
    %64 = arith.negf %63 : vector<1x128xf32>
    %65 = math.exp %64 : vector<1x128xf32>
    %cst_29 = arith.constant 1.000000e+00 : f32
    %66 = vector.broadcast %cst_29 : f32 to vector<1x128xf32>
    %67 = arith.addf %66, %65 : vector<1x128xf32>
    %68 = arith.divf %66, %67 : vector<1x128xf32>
    %69 = vector.extract_strided_slice %62 {offsets = [0, 128], sizes = [1, 128], strides = [1, 1]} : vector<1x512xf32> to vector<1x128xf32>
    %70 = arith.negf %69 : vector<1x128xf32>
    %71 = math.exp %70 : vector<1x128xf32>
    %cst_30 = arith.constant 1.000000e+00 : f32
    %72 = vector.broadcast %cst_30 : f32 to vector<1x128xf32>
    %73 = arith.addf %72, %71 : vector<1x128xf32>
    %74 = arith.divf %72, %73 : vector<1x128xf32>
    %75 = vector.extract_strided_slice %62 {offsets = [0, 256], sizes = [1, 128], strides = [1, 1]} : vector<1x512xf32> to vector<1x128xf32>
    %76 = math.tanh %75 : vector<1x128xf32>
    %77 = vector.extract_strided_slice %62 {offsets = [0, 384], sizes = [1, 128], strides = [1, 1]} : vector<1x512xf32> to vector<1x128xf32>
    %78 = arith.negf %77 : vector<1x128xf32>
    %79 = math.exp %78 : vector<1x128xf32>
    %cst_31 = arith.constant 1.000000e+00 : f32
    %80 = vector.broadcast %cst_31 : f32 to vector<1x128xf32>
    %81 = arith.addf %80, %79 : vector<1x128xf32>
    %82 = arith.divf %80, %81 : vector<1x128xf32>
    %83 = arith.mulf %74, %47 : vector<1x128xf32>
    %84 = arith.mulf %68, %76 : vector<1x128xf32>
    %85 = arith.addf %83, %84 : vector<1x128xf32>
    %86 = math.tanh %85 : vector<1x128xf32>
    %87 = arith.mulf %82, %86 : vector<1x128xf32>
    %c1_i32_32 = arith.constant 1 : i32
    %88 = arith.cmpi slt, %49, %c1_i32_32 : i32
    %89 = arith.select %88, %87, %46 : vector<1x128xf32>
    %90 = arith.select %88, %85, %47 : vector<1x128xf32>
    %c8_i32_33 = arith.constant 8 : i32
    %91 = arith.muli %arg0, %c8_i32_33 : i32
    %c2_i32 = arith.constant 2 : i32
    %92 = arith.addi %91, %c2_i32 : i32
    %93 = arith.index_cast %92 : i32 to index
    %94 = memref.load %arg1[%93] : memref<8xi32, #tpu.memory_space<smem>>
    %95 = arith.index_cast %94 : i32 to index
    %c0_34 = arith.constant 0 : index
    %96 = vector.load %arg2[%95, %c0_34] : memref<128x128xf32, #tpu.memory_space<vmem>>, vector<1x128xf32>
    %cst_35 = arith.constant 0.000000e+00 : f32
    %97 = vector.broadcast %cst_35 : f32 to vector<1x128xf32>
    %98 = arith.maximumf %96, %97 : vector<1x128xf32>
    %c0_36 = arith.constant 0 : index
    %c0_37 = arith.constant 0 : index
    %99 = vector.load %arg3[%c0_36, %c0_37] : memref<128x512xf32, #tpu.memory_space<vmem>>, vector<128x512xf32>
    %cst_38 = arith.constant dense<0.000000e+00> : vector<1x512xf32>
    %100 = tpu.matmul %98, %99, %cst_38 {dimension_numbers = #tpu.dot_dimension_numbers<[1], [0], [0], [1], [0, 0, 1, 1], [], []>} : vector<1x128xf32>, vector<128x512xf32>, vector<1x512xf32> -> vector<1x512xf32>
    %c0_39 = arith.constant 0 : index
    %c0_40 = arith.constant 0 : index
    %101 = vector.load %arg4[%c0_39, %c0_40] : memref<128x512xf32, #tpu.memory_space<vmem>>, vector<128x512xf32>
    %cst_41 = arith.constant dense<0.000000e+00> : vector<1x512xf32>
    %102 = tpu.matmul %89, %101, %cst_41 {dimension_numbers = #tpu.dot_dimension_numbers<[1], [0], [0], [1], [0, 0, 1, 1], [], []>} : vector<1x128xf32>, vector<128x512xf32>, vector<1x512xf32> -> vector<1x512xf32>
    %103 = arith.addf %100, %102 : vector<1x512xf32>
    %c0_42 = arith.constant 0 : index
    %c0_43 = arith.constant 0 : index
    %104 = vector.load %arg5[%c0_42, %c0_43] : memref<1x512xf32, #tpu.memory_space<vmem>>, vector<1x512xf32>
    %105 = arith.addf %103, %104 : vector<1x512xf32>
    %106 = vector.extract_strided_slice %105 {offsets = [0, 0], sizes = [1, 128], strides = [1, 1]} : vector<1x512xf32> to vector<1x128xf32>
    %107 = arith.negf %106 : vector<1x128xf32>
    %108 = math.exp %107 : vector<1x128xf32>
    %cst_44 = arith.constant 1.000000e+00 : f32
    %109 = vector.broadcast %cst_44 : f32 to vector<1x128xf32>
    %110 = arith.addf %109, %108 : vector<1x128xf32>
    %111 = arith.divf %109, %110 : vector<1x128xf32>
    %112 = vector.extract_strided_slice %105 {offsets = [0, 128], sizes = [1, 128], strides = [1, 1]} : vector<1x512xf32> to vector<1x128xf32>
    %113 = arith.negf %112 : vector<1x128xf32>
    %114 = math.exp %113 : vector<1x128xf32>
    %cst_45 = arith.constant 1.000000e+00 : f32
    %115 = vector.broadcast %cst_45 : f32 to vector<1x128xf32>
    %116 = arith.addf %115, %114 : vector<1x128xf32>
    %117 = arith.divf %115, %116 : vector<1x128xf32>
    %118 = vector.extract_strided_slice %105 {offsets = [0, 256], sizes = [1, 128], strides = [1, 1]} : vector<1x512xf32> to vector<1x128xf32>
    %119 = math.tanh %118 : vector<1x128xf32>
    %120 = vector.extract_strided_slice %105 {offsets = [0, 384], sizes = [1, 128], strides = [1, 1]} : vector<1x512xf32> to vector<1x128xf32>
    %121 = arith.negf %120 : vector<1x128xf32>
    %122 = math.exp %121 : vector<1x128xf32>
    %cst_46 = arith.constant 1.000000e+00 : f32
    %123 = vector.broadcast %cst_46 : f32 to vector<1x128xf32>
    %124 = arith.addf %123, %122 : vector<1x128xf32>
    %125 = arith.divf %123, %124 : vector<1x128xf32>
    %126 = arith.mulf %117, %90 : vector<1x128xf32>
    %127 = arith.mulf %111, %119 : vector<1x128xf32>
    %128 = arith.addf %126, %127 : vector<1x128xf32>
    %129 = math.tanh %128 : vector<1x128xf32>
    %130 = arith.mulf %125, %129 : vector<1x128xf32>
    %c1_i32_47 = arith.constant 1 : i32
    %131 = arith.cmpi slt, %92, %c1_i32_47 : i32
    %132 = arith.select %131, %130, %89 : vector<1x128xf32>
    %133 = arith.select %131, %128, %90 : vector<1x128xf32>
    %c8_i32_48 = arith.constant 8 : i32
    %134 = arith.muli %arg0, %c8_i32_48 : i32
    %c3_i32 = arith.constant 3 : i32
    %135 = arith.addi %134, %c3_i32 : i32
    %136 = arith.index_cast %135 : i32 to index
    %137 = memref.load %arg1[%136] : memref<8xi32, #tpu.memory_space<smem>>
    %138 = arith.index_cast %137 : i32 to index
    %c0_49 = arith.constant 0 : index
    %139 = vector.load %arg2[%138, %c0_49] : memref<128x128xf32, #tpu.memory_space<vmem>>, vector<1x128xf32>
    %cst_50 = arith.constant 0.000000e+00 : f32
    %140 = vector.broadcast %cst_50 : f32 to vector<1x128xf32>
    %141 = arith.maximumf %139, %140 : vector<1x128xf32>
    %c0_51 = arith.constant 0 : index
    %c0_52 = arith.constant 0 : index
    %142 = vector.load %arg3[%c0_51, %c0_52] : memref<128x512xf32, #tpu.memory_space<vmem>>, vector<128x512xf32>
    %cst_53 = arith.constant dense<0.000000e+00> : vector<1x512xf32>
    %143 = tpu.matmul %141, %142, %cst_53 {dimension_numbers = #tpu.dot_dimension_numbers<[1], [0], [0], [1], [0, 0, 1, 1], [], []>} : vector<1x128xf32>, vector<128x512xf32>, vector<1x512xf32> -> vector<1x512xf32>
    %c0_54 = arith.constant 0 : index
    %c0_55 = arith.constant 0 : index
    %144 = vector.load %arg4[%c0_54, %c0_55] : memref<128x512xf32, #tpu.memory_space<vmem>>, vector<128x512xf32>
    %cst_56 = arith.constant dense<0.000000e+00> : vector<1x512xf32>
    %145 = tpu.matmul %132, %144, %cst_56 {dimension_numbers = #tpu.dot_dimension_numbers<[1], [0], [0], [1], [0, 0, 1, 1], [], []>} : vector<1x128xf32>, vector<128x512xf32>, vector<1x512xf32> -> vector<1x512xf32>
    %146 = arith.addf %143, %145 : vector<1x512xf32>
    %c0_57 = arith.constant 0 : index
    %c0_58 = arith.constant 0 : index
    %147 = vector.load %arg5[%c0_57, %c0_58] : memref<1x512xf32, #tpu.memory_space<vmem>>, vector<1x512xf32>
    %148 = arith.addf %146, %147 : vector<1x512xf32>
    %149 = vector.extract_strided_slice %148 {offsets = [0, 0], sizes = [1, 128], strides = [1, 1]} : vector<1x512xf32> to vector<1x128xf32>
    %150 = arith.negf %149 : vector<1x128xf32>
    %151 = math.exp %150 : vector<1x128xf32>
    %cst_59 = arith.constant 1.000000e+00 : f32
    %152 = vector.broadcast %cst_59 : f32 to vector<1x128xf32>
    %153 = arith.addf %152, %151 : vector<1x128xf32>
    %154 = arith.divf %152, %153 : vector<1x128xf32>
    %155 = vector.extract_strided_slice %148 {offsets = [0, 128], sizes = [1, 128], strides = [1, 1]} : vector<1x512xf32> to vector<1x128xf32>
    %156 = arith.negf %155 : vector<1x128xf32>
    %157 = math.exp %156 : vector<1x128xf32>
    %cst_60 = arith.constant 1.000000e+00 : f32
    %158 = vector.broadcast %cst_60 : f32 to vector<1x128xf32>
    %159 = arith.addf %158, %157 : vector<1x128xf32>
    %160 = arith.divf %158, %159 : vector<1x128xf32>
    %161 = vector.extract_strided_slice %148 {offsets = [0, 256], sizes = [1, 128], strides = [1, 1]} : vector<1x512xf32> to vector<1x128xf32>
    %162 = math.tanh %161 : vector<1x128xf32>
    %163 = vector.extract_strided_slice %148 {offsets = [0, 384], sizes = [1, 128], strides = [1, 1]} : vector<1x512xf32> to vector<1x128xf32>
    %164 = arith.negf %163 : vector<1x128xf32>
    %165 = math.exp %164 : vector<1x128xf32>
    %cst_61 = arith.constant 1.000000e+00 : f32
    %166 = vector.broadcast %cst_61 : f32 to vector<1x128xf32>
    %167 = arith.addf %166, %165 : vector<1x128xf32>
    %168 = arith.divf %166, %167 : vector<1x128xf32>
    %169 = arith.mulf %160, %133 : vector<1x128xf32>
    %170 = arith.mulf %154, %162 : vector<1x128xf32>
    %171 = arith.addf %169, %170 : vector<1x128xf32>
    %172 = math.tanh %171 : vector<1x128xf32>
    %173 = arith.mulf %168, %172 : vector<1x128xf32>
    %c1_i32_62 = arith.constant 1 : i32
    %174 = arith.cmpi slt, %135, %c1_i32_62 : i32
    %175 = arith.select %174, %173, %132 : vector<1x128xf32>
    %176 = arith.select %174, %171, %133 : vector<1x128xf32>
    %c8_i32_63 = arith.constant 8 : i32
    %177 = arith.muli %arg0, %c8_i32_63 : i32
    %c4_i32 = arith.constant 4 : i32
    %178 = arith.addi %177, %c4_i32 : i32
    %179 = arith.index_cast %178 : i32 to index
    %180 = memref.load %arg1[%179] : memref<8xi32, #tpu.memory_space<smem>>
    %181 = arith.index_cast %180 : i32 to index
    %c0_64 = arith.constant 0 : index
    %182 = vector.load %arg2[%181, %c0_64] : memref<128x128xf32, #tpu.memory_space<vmem>>, vector<1x128xf32>
    %cst_65 = arith.constant 0.000000e+00 : f32
    %183 = vector.broadcast %cst_65 : f32 to vector<1x128xf32>
    %184 = arith.maximumf %182, %183 : vector<1x128xf32>
    %c0_66 = arith.constant 0 : index
    %c0_67 = arith.constant 0 : index
    %185 = vector.load %arg3[%c0_66, %c0_67] : memref<128x512xf32, #tpu.memory_space<vmem>>, vector<128x512xf32>
    %cst_68 = arith.constant dense<0.000000e+00> : vector<1x512xf32>
    %186 = tpu.matmul %184, %185, %cst_68 {dimension_numbers = #tpu.dot_dimension_numbers<[1], [0], [0], [1], [0, 0, 1, 1], [], []>} : vector<1x128xf32>, vector<128x512xf32>, vector<1x512xf32> -> vector<1x512xf32>
    %c0_69 = arith.constant 0 : index
    %c0_70 = arith.constant 0 : index
    %187 = vector.load %arg4[%c0_69, %c0_70] : memref<128x512xf32, #tpu.memory_space<vmem>>, vector<128x512xf32>
    %cst_71 = arith.constant dense<0.000000e+00> : vector<1x512xf32>
    %188 = tpu.matmul %175, %187, %cst_71 {dimension_numbers = #tpu.dot_dimension_numbers<[1], [0], [0], [1], [0, 0, 1, 1], [], []>} : vector<1x128xf32>, vector<128x512xf32>, vector<1x512xf32> -> vector<1x512xf32>
    %189 = arith.addf %186, %188 : vector<1x512xf32>
    %c0_72 = arith.constant 0 : index
    %c0_73 = arith.constant 0 : index
    %190 = vector.load %arg5[%c0_72, %c0_73] : memref<1x512xf32, #tpu.memory_space<vmem>>, vector<1x512xf32>
    %191 = arith.addf %189, %190 : vector<1x512xf32>
    %192 = vector.extract_strided_slice %191 {offsets = [0, 0], sizes = [1, 128], strides = [1, 1]} : vector<1x512xf32> to vector<1x128xf32>
    %193 = arith.negf %192 : vector<1x128xf32>
    %194 = math.exp %193 : vector<1x128xf32>
    %cst_74 = arith.constant 1.000000e+00 : f32
    %195 = vector.broadcast %cst_74 : f32 to vector<1x128xf32>
    %196 = arith.addf %195, %194 : vector<1x128xf32>
    %197 = arith.divf %195, %196 : vector<1x128xf32>
    %198 = vector.extract_strided_slice %191 {offsets = [0, 128], sizes = [1, 128], strides = [1, 1]} : vector<1x512xf32> to vector<1x128xf32>
    %199 = arith.negf %198 : vector<1x128xf32>
    %200 = math.exp %199 : vector<1x128xf32>
    %cst_75 = arith.constant 1.000000e+00 : f32
    %201 = vector.broadcast %cst_75 : f32 to vector<1x128xf32>
    %202 = arith.addf %201, %200 : vector<1x128xf32>
    %203 = arith.divf %201, %202 : vector<1x128xf32>
    %204 = vector.extract_strided_slice %191 {offsets = [0, 256], sizes = [1, 128], strides = [1, 1]} : vector<1x512xf32> to vector<1x128xf32>
    %205 = math.tanh %204 : vector<1x128xf32>
    %206 = vector.extract_strided_slice %191 {offsets = [0, 384], sizes = [1, 128], strides = [1, 1]} : vector<1x512xf32> to vector<1x128xf32>
    %207 = arith.negf %206 : vector<1x128xf32>
    %208 = math.exp %207 : vector<1x128xf32>
    %cst_76 = arith.constant 1.000000e+00 : f32
    %209 = vector.broadcast %cst_76 : f32 to vector<1x128xf32>
    %210 = arith.addf %209, %208 : vector<1x128xf32>
    %211 = arith.divf %209, %210 : vector<1x128xf32>
    %212 = arith.mulf %203, %176 : vector<1x128xf32>
    %213 = arith.mulf %197, %205 : vector<1x128xf32>
    %214 = arith.addf %212, %213 : vector<1x128xf32>
    %215 = math.tanh %214 : vector<1x128xf32>
    %216 = arith.mulf %211, %215 : vector<1x128xf32>
    %c1_i32_77 = arith.constant 1 : i32
    %217 = arith.cmpi slt, %178, %c1_i32_77 : i32
    %218 = arith.select %217, %216, %175 : vector<1x128xf32>
    %219 = arith.select %217, %214, %176 : vector<1x128xf32>
    %c8_i32_78 = arith.constant 8 : i32
    %220 = arith.muli %arg0, %c8_i32_78 : i32
    %c5_i32 = arith.constant 5 : i32
    %221 = arith.addi %220, %c5_i32 : i32
    %222 = arith.index_cast %221 : i32 to index
    %223 = memref.load %arg1[%222] : memref<8xi32, #tpu.memory_space<smem>>
    %224 = arith.index_cast %223 : i32 to index
    %c0_79 = arith.constant 0 : index
    %225 = vector.load %arg2[%224, %c0_79] : memref<128x128xf32, #tpu.memory_space<vmem>>, vector<1x128xf32>
    %cst_80 = arith.constant 0.000000e+00 : f32
    %226 = vector.broadcast %cst_80 : f32 to vector<1x128xf32>
    %227 = arith.maximumf %225, %226 : vector<1x128xf32>
    %c0_81 = arith.constant 0 : index
    %c0_82 = arith.constant 0 : index
    %228 = vector.load %arg3[%c0_81, %c0_82] : memref<128x512xf32, #tpu.memory_space<vmem>>, vector<128x512xf32>
    %cst_83 = arith.constant dense<0.000000e+00> : vector<1x512xf32>
    %229 = tpu.matmul %227, %228, %cst_83 {dimension_numbers = #tpu.dot_dimension_numbers<[1], [0], [0], [1], [0, 0, 1, 1], [], []>} : vector<1x128xf32>, vector<128x512xf32>, vector<1x512xf32> -> vector<1x512xf32>
    %c0_84 = arith.constant 0 : index
    %c0_85 = arith.constant 0 : index
    %230 = vector.load %arg4[%c0_84, %c0_85] : memref<128x512xf32, #tpu.memory_space<vmem>>, vector<128x512xf32>
    %cst_86 = arith.constant dense<0.000000e+00> : vector<1x512xf32>
    %231 = tpu.matmul %218, %230, %cst_86 {dimension_numbers = #tpu.dot_dimension_numbers<[1], [0], [0], [1], [0, 0, 1, 1], [], []>} : vector<1x128xf32>, vector<128x512xf32>, vector<1x512xf32> -> vector<1x512xf32>
    %232 = arith.addf %229, %231 : vector<1x512xf32>
    %c0_87 = arith.constant 0 : index
    %c0_88 = arith.constant 0 : index
    %233 = vector.load %arg5[%c0_87, %c0_88] : memref<1x512xf32, #tpu.memory_space<vmem>>, vector<1x512xf32>
    %234 = arith.addf %232, %233 : vector<1x512xf32>
    %235 = vector.extract_strided_slice %234 {offsets = [0, 0], sizes = [1, 128], strides = [1, 1]} : vector<1x512xf32> to vector<1x128xf32>
    %236 = arith.negf %235 : vector<1x128xf32>
    %237 = math.exp %236 : vector<1x128xf32>
    %cst_89 = arith.constant 1.000000e+00 : f32
    %238 = vector.broadcast %cst_89 : f32 to vector<1x128xf32>
    %239 = arith.addf %238, %237 : vector<1x128xf32>
    %240 = arith.divf %238, %239 : vector<1x128xf32>
    %241 = vector.extract_strided_slice %234 {offsets = [0, 128], sizes = [1, 128], strides = [1, 1]} : vector<1x512xf32> to vector<1x128xf32>
    %242 = arith.negf %241 : vector<1x128xf32>
    %243 = math.exp %242 : vector<1x128xf32>
    %cst_90 = arith.constant 1.000000e+00 : f32
    %244 = vector.broadcast %cst_90 : f32 to vector<1x128xf32>
    %245 = arith.addf %244, %243 : vector<1x128xf32>
    %246 = arith.divf %244, %245 : vector<1x128xf32>
    %247 = vector.extract_strided_slice %234 {offsets = [0, 256], sizes = [1, 128], strides = [1, 1]} : vector<1x512xf32> to vector<1x128xf32>
    %248 = math.tanh %247 : vector<1x128xf32>
    %249 = vector.extract_strided_slice %234 {offsets = [0, 384], sizes = [1, 128], strides = [1, 1]} : vector<1x512xf32> to vector<1x128xf32>
    %250 = arith.negf %249 : vector<1x128xf32>
    %251 = math.exp %250 : vector<1x128xf32>
    %cst_91 = arith.constant 1.000000e+00 : f32
    %252 = vector.broadcast %cst_91 : f32 to vector<1x128xf32>
    %253 = arith.addf %252, %251 : vector<1x128xf32>
    %254 = arith.divf %252, %253 : vector<1x128xf32>
    %255 = arith.mulf %246, %219 : vector<1x128xf32>
    %256 = arith.mulf %240, %248 : vector<1x128xf32>
    %257 = arith.addf %255, %256 : vector<1x128xf32>
    %258 = math.tanh %257 : vector<1x128xf32>
    %259 = arith.mulf %254, %258 : vector<1x128xf32>
    %c1_i32_92 = arith.constant 1 : i32
    %260 = arith.cmpi slt, %221, %c1_i32_92 : i32
    %261 = arith.select %260, %259, %218 : vector<1x128xf32>
    %262 = arith.select %260, %257, %219 : vector<1x128xf32>
    %c8_i32_93 = arith.constant 8 : i32
    %263 = arith.muli %arg0, %c8_i32_93 : i32
    %c6_i32 = arith.constant 6 : i32
    %264 = arith.addi %263, %c6_i32 : i32
    %265 = arith.index_cast %264 : i32 to index
    %266 = memref.load %arg1[%265] : memref<8xi32, #tpu.memory_space<smem>>
    %267 = arith.index_cast %266 : i32 to index
    %c0_94 = arith.constant 0 : index
    %268 = vector.load %arg2[%267, %c0_94] : memref<128x128xf32, #tpu.memory_space<vmem>>, vector<1x128xf32>
    %cst_95 = arith.constant 0.000000e+00 : f32
    %269 = vector.broadcast %cst_95 : f32 to vector<1x128xf32>
    %270 = arith.maximumf %268, %269 : vector<1x128xf32>
    %c0_96 = arith.constant 0 : index
    %c0_97 = arith.constant 0 : index
    %271 = vector.load %arg3[%c0_96, %c0_97] : memref<128x512xf32, #tpu.memory_space<vmem>>, vector<128x512xf32>
    %cst_98 = arith.constant dense<0.000000e+00> : vector<1x512xf32>
    %272 = tpu.matmul %270, %271, %cst_98 {dimension_numbers = #tpu.dot_dimension_numbers<[1], [0], [0], [1], [0, 0, 1, 1], [], []>} : vector<1x128xf32>, vector<128x512xf32>, vector<1x512xf32> -> vector<1x512xf32>
    %c0_99 = arith.constant 0 : index
    %c0_100 = arith.constant 0 : index
    %273 = vector.load %arg4[%c0_99, %c0_100] : memref<128x512xf32, #tpu.memory_space<vmem>>, vector<128x512xf32>
    %cst_101 = arith.constant dense<0.000000e+00> : vector<1x512xf32>
    %274 = tpu.matmul %261, %273, %cst_101 {dimension_numbers = #tpu.dot_dimension_numbers<[1], [0], [0], [1], [0, 0, 1, 1], [], []>} : vector<1x128xf32>, vector<128x512xf32>, vector<1x512xf32> -> vector<1x512xf32>
    %275 = arith.addf %272, %274 : vector<1x512xf32>
    %c0_102 = arith.constant 0 : index
    %c0_103 = arith.constant 0 : index
    %276 = vector.load %arg5[%c0_102, %c0_103] : memref<1x512xf32, #tpu.memory_space<vmem>>, vector<1x512xf32>
    %277 = arith.addf %275, %276 : vector<1x512xf32>
    %278 = vector.extract_strided_slice %277 {offsets = [0, 0], sizes = [1, 128], strides = [1, 1]} : vector<1x512xf32> to vector<1x128xf32>
    %279 = arith.negf %278 : vector<1x128xf32>
    %280 = math.exp %279 : vector<1x128xf32>
    %cst_104 = arith.constant 1.000000e+00 : f32
    %281 = vector.broadcast %cst_104 : f32 to vector<1x128xf32>
    %282 = arith.addf %281, %280 : vector<1x128xf32>
    %283 = arith.divf %281, %282 : vector<1x128xf32>
    %284 = vector.extract_strided_slice %277 {offsets = [0, 128], sizes = [1, 128], strides = [1, 1]} : vector<1x512xf32> to vector<1x128xf32>
    %285 = arith.negf %284 : vector<1x128xf32>
    %286 = math.exp %285 : vector<1x128xf32>
    %cst_105 = arith.constant 1.000000e+00 : f32
    %287 = vector.broadcast %cst_105 : f32 to vector<1x128xf32>
    %288 = arith.addf %287, %286 : vector<1x128xf32>
    %289 = arith.divf %287, %288 : vector<1x128xf32>
    %290 = vector.extract_strided_slice %277 {offsets = [0, 256], sizes = [1, 128], strides = [1, 1]} : vector<1x512xf32> to vector<1x128xf32>
    %291 = math.tanh %290 : vector<1x128xf32>
    %292 = vector.extract_strided_slice %277 {offsets = [0, 384], sizes = [1, 128], strides = [1, 1]} : vector<1x512xf32> to vector<1x128xf32>
    %293 = arith.negf %292 : vector<1x128xf32>
    %294 = math.exp %293 : vector<1x128xf32>
    %cst_106 = arith.constant 1.000000e+00 : f32
    %295 = vector.broadcast %cst_106 : f32 to vector<1x128xf32>
    %296 = arith.addf %295, %294 : vector<1x128xf32>
    %297 = arith.divf %295, %296 : vector<1x128xf32>
    %298 = arith.mulf %289, %262 : vector<1x128xf32>
    %299 = arith.mulf %283, %291 : vector<1x128xf32>
    %300 = arith.addf %298, %299 : vector<1x128xf32>
    %301 = math.tanh %300 : vector<1x128xf32>
    %302 = arith.mulf %297, %301 : vector<1x128xf32>
    %c1_i32_107 = arith.constant 1 : i32
    %303 = arith.cmpi slt, %264, %c1_i32_107 : i32
    %304 = arith.select %303, %302, %261 : vector<1x128xf32>
    %305 = arith.select %303, %300, %262 : vector<1x128xf32>
    %c8_i32_108 = arith.constant 8 : i32
    %306 = arith.muli %arg0, %c8_i32_108 : i32
    %c7_i32 = arith.constant 7 : i32
    %307 = arith.addi %306, %c7_i32 : i32
    %308 = arith.index_cast %307 : i32 to index
    %309 = memref.load %arg1[%308] : memref<8xi32, #tpu.memory_space<smem>>
    %310 = arith.index_cast %309 : i32 to index
    %c0_109 = arith.constant 0 : index
    %311 = vector.load %arg2[%310, %c0_109] : memref<128x128xf32, #tpu.memory_space<vmem>>, vector<1x128xf32>
    %cst_110 = arith.constant 0.000000e+00 : f32
    %312 = vector.broadcast %cst_110 : f32 to vector<1x128xf32>
    %313 = arith.maximumf %311, %312 : vector<1x128xf32>
    %c0_111 = arith.constant 0 : index
    %c0_112 = arith.constant 0 : index
    %314 = vector.load %arg3[%c0_111, %c0_112] : memref<128x512xf32, #tpu.memory_space<vmem>>, vector<128x512xf32>
    %cst_113 = arith.constant dense<0.000000e+00> : vector<1x512xf32>
    %315 = tpu.matmul %313, %314, %cst_113 {dimension_numbers = #tpu.dot_dimension_numbers<[1], [0], [0], [1], [0, 0, 1, 1], [], []>} : vector<1x128xf32>, vector<128x512xf32>, vector<1x512xf32> -> vector<1x512xf32>
    %c0_114 = arith.constant 0 : index
    %c0_115 = arith.constant 0 : index
    %316 = vector.load %arg4[%c0_114, %c0_115] : memref<128x512xf32, #tpu.memory_space<vmem>>, vector<128x512xf32>
    %cst_116 = arith.constant dense<0.000000e+00> : vector<1x512xf32>
    %317 = tpu.matmul %304, %316, %cst_116 {dimension_numbers = #tpu.dot_dimension_numbers<[1], [0], [0], [1], [0, 0, 1, 1], [], []>} : vector<1x128xf32>, vector<128x512xf32>, vector<1x512xf32> -> vector<1x512xf32>
    %318 = arith.addf %315, %317 : vector<1x512xf32>
    %c0_117 = arith.constant 0 : index
    %c0_118 = arith.constant 0 : index
    %319 = vector.load %arg5[%c0_117, %c0_118] : memref<1x512xf32, #tpu.memory_space<vmem>>, vector<1x512xf32>
    %320 = arith.addf %318, %319 : vector<1x512xf32>
    %321 = vector.extract_strided_slice %320 {offsets = [0, 0], sizes = [1, 128], strides = [1, 1]} : vector<1x512xf32> to vector<1x128xf32>
    %322 = arith.negf %321 : vector<1x128xf32>
    %323 = math.exp %322 : vector<1x128xf32>
    %cst_119 = arith.constant 1.000000e+00 : f32
    %324 = vector.broadcast %cst_119 : f32 to vector<1x128xf32>
    %325 = arith.addf %324, %323 : vector<1x128xf32>
    %326 = arith.divf %324, %325 : vector<1x128xf32>
    %327 = vector.extract_strided_slice %320 {offsets = [0, 128], sizes = [1, 128], strides = [1, 1]} : vector<1x512xf32> to vector<1x128xf32>
    %328 = arith.negf %327 : vector<1x128xf32>
    %329 = math.exp %328 : vector<1x128xf32>
    %cst_120 = arith.constant 1.000000e+00 : f32
    %330 = vector.broadcast %cst_120 : f32 to vector<1x128xf32>
    %331 = arith.addf %330, %329 : vector<1x128xf32>
    %332 = arith.divf %330, %331 : vector<1x128xf32>
    %333 = vector.extract_strided_slice %320 {offsets = [0, 256], sizes = [1, 128], strides = [1, 1]} : vector<1x512xf32> to vector<1x128xf32>
    %334 = math.tanh %333 : vector<1x128xf32>
    %335 = vector.extract_strided_slice %320 {offsets = [0, 384], sizes = [1, 128], strides = [1, 1]} : vector<1x512xf32> to vector<1x128xf32>
    %336 = arith.negf %335 : vector<1x128xf32>
    %337 = math.exp %336 : vector<1x128xf32>
    %cst_121 = arith.constant 1.000000e+00 : f32
    %338 = vector.broadcast %cst_121 : f32 to vector<1x128xf32>
    %339 = arith.addf %338, %337 : vector<1x128xf32>
    %340 = arith.divf %338, %339 : vector<1x128xf32>
    %341 = arith.mulf %332, %305 : vector<1x128xf32>
    %342 = arith.mulf %326, %334 : vector<1x128xf32>
    %343 = arith.addf %341, %342 : vector<1x128xf32>
    %344 = math.tanh %343 : vector<1x128xf32>
    %345 = arith.mulf %340, %344 : vector<1x128xf32>
    %c1_i32_122 = arith.constant 1 : i32
    %346 = arith.cmpi slt, %307, %c1_i32_122 : i32
    %347 = arith.select %346, %345, %304 : vector<1x128xf32>
    %348 = arith.select %346, %343, %305 : vector<1x128xf32>
    %349 = tpu.concatenate %46, %89, %132, %175, %218, %261, %304, %347 in 0 : vector<1x128xf32>, vector<1x128xf32>, vector<1x128xf32>, vector<1x128xf32>, vector<1x128xf32>, vector<1x128xf32>, vector<1x128xf32>, vector<1x128xf32> -> vector<8x128xf32>
    %c0_123 = arith.constant 0 : index
    %c0_124 = arith.constant 0 : index
    %350 = vector.load %arg8[%c0_123, %c0_124] : memref<8x128xf32, #tpu.memory_space<vmem>>, vector<8x128xf32>
    tpu.vector_store %arg8[%c0_123, %c0_124], %349 {strides = array<i32>} : memref<8x128xf32, #tpu.memory_space<vmem>>, vector<8x128xf32>,
    %c0_125 = arith.constant 0 : index
    %c0_126 = arith.constant 0 : index
    %351 = vector.load %arg11[%c0_125, %c0_126] : memref<1x128xf32, #tpu.memory_space<vmem>>, vector<1x128xf32>
    tpu.vector_store %arg11[%c0_125, %c0_126], %347 {strides = array<i32>} : memref<1x128xf32, #tpu.memory_space<vmem>>, vector<1x128xf32>,
    %c0_127 = arith.constant 0 : index
    %c0_128 = arith.constant 0 : index
    %352 = vector.load %arg12[%c0_127, %c0_128] : memref<1x128xf32, #tpu.memory_space<vmem>>, vector<1x128xf32>
    tpu.vector_store %arg12[%c0_127, %c0_128], %348 {strides = array<i32>} : memref<1x128xf32, #tpu.memory_space<vmem>>, vector<1x128xf32>,
    %c0_129 = arith.constant 0 : index
    %c0_130 = arith.constant 0 : index
    %353 = vector.load %arg9[%c0_129, %c0_130] : memref<1x128xf32, #tpu.memory_space<vmem>>, vector<1x128xf32>
    tpu.vector_store %arg9[%c0_129, %c0_130], %347 {strides = array<i32>} : memref<1x128xf32, #tpu.memory_space<vmem>>, vector<1x128xf32>,
    %c0_131 = arith.constant 0 : index
    %c0_132 = arith.constant 0 : index
    %354 = vector.load %arg10[%c0_131, %c0_132] : memref<1x128xf32, #tpu.memory_space<vmem>>, vector<1x128xf32>
    tpu.vector_store %arg10[%c0_131, %c0_132], %348 {strides = array<i32>} : memref<1x128xf32, #tpu.memory_space<vmem>>, vector<1x128xf32>,
    return
  }
  func.func @transform_0(%arg0: i32, %arg1: memref<8xi32, #tpu.memory_space<smem>>) -> (i32, i32) {
    %c0_i32 = arith.constant 0 : i32
    %c0_i32_0 = arith.constant 0 : i32
    %c0_i32_1 = arith.constant 0 : i32
    return %c0_i32, %c0_i32_0 : i32, i32
  }
  func.func @transform_1(%arg0: i32, %arg1: memref<8xi32, #tpu.memory_space<smem>>) -> (i32, i32) {
    %c0_i32 = arith.constant 0 : i32
    %c0_i32_0 = arith.constant 0 : i32
    %c0_i32_1 = arith.constant 0 : i32
    return %c0_i32, %c0_i32_0 : i32, i32
  }
  func.func @transform_2(%arg0: i32, %arg1: memref<8xi32, #tpu.memory_space<smem>>) -> (i32, i32) {
    %c0_i32 = arith.constant 0 : i32
    %c0_i32_0 = arith.constant 0 : i32
    %c0_i32_1 = arith.constant 0 : i32
    return %c0_i32, %c0_i32_0 : i32, i32
  }
  func.func @transform_3(%arg0: i32, %arg1: memref<8xi32, #tpu.memory_space<smem>>) -> (i32, i32) {
    %c0_i32 = arith.constant 0 : i32
    %c0_i32_0 = arith.constant 0 : i32
    %c0_i32_1 = arith.constant 0 : i32
    return %c0_i32, %c0_i32_0 : i32, i32
  }
  func.func @transform_4(%arg0: i32, %arg1: memref<8xi32, #tpu.memory_space<smem>>) -> (i32, i32) {
    %c0_i32 = arith.constant 0 : i32
    %c0_i32_0 = arith.constant 0 : i32
    %c0_i32_1 = arith.constant 0 : i32
    return %c0_i32, %c0_i32_0 : i32, i32
  }
  func.func @transform_5(%arg0: i32, %arg1: memref<8xi32, #tpu.memory_space<smem>>) -> (i32, i32) {
    %c0_i32 = arith.constant 0 : i32
    %c0_i32_0 = arith.constant 0 : i32
    %c0_i32_1 = arith.constant 0 : i32
    return %c0_i32, %c0_i32_0 : i32, i32
  }
  func.func @transform_6(%arg0: i32, %arg1: memref<8xi32, #tpu.memory_space<smem>>) -> (i32, i32) {
    %c0_i32 = arith.constant 0 : i32
    %c0_i32_0 = arith.constant 0 : i32
    return %arg0, %c0_i32 : i32, i32
  }
  func.func @transform_7(%arg0: i32, %arg1: memref<8xi32, #tpu.memory_space<smem>>) -> (i32, i32) {
    %c0_i32 = arith.constant 0 : i32
    %c0_i32_0 = arith.constant 0 : i32
    %c0_i32_1 = arith.constant 0 : i32
    return %c0_i32, %c0_i32_0 : i32, i32
  }
  func.func @transform_8(%arg0: i32, %arg1: memref<8xi32, #tpu.memory_space<smem>>) -> (i32, i32) {
    %c0_i32 = arith.constant 0 : i32
    %c0_i32_0 = arith.constant 0 : i32
    %c0_i32_1 = arith.constant 0 : i32
    return %c0_i32, %c0_i32_0 : i32, i32
  }
}

</mosaic_0001>

<bundles_post_ra>
// kernel: tpu_custom_call.1
= control target key start
LH: loop header
LB: loop body
LE: loop exit
PB: predicated region body
PF: predicated region fallthrough
CT: control target
= control target key end

     0   :  { %s5010_s0 = inlined_call_operand.hbm [shape: s32[8], index: 0, kind: input, shape index: {}]   ;;  %s5011_s1 = inlined_call_operand.hbm [shape: f32[128,128], index: 1, kind: input, shape index: {}]   ;;  %s5012_s2 = inlined_call_operand.hbm [shape: f32[128,512], index: 2, kind: input, shape index: {}]   ;;  %s5013_s3 = inlined_call_operand.hbm [shape: f32[128,512], index: 3, kind: input, shape index: {}]   ;;  %s5014_s4 = inlined_call_operand.vmem [shape: f32[1,512], index: 4, kind: input, shape index: {}]   ;;  %s5015_s5 = inlined_call_operand.vmem [shape: f32[1,128], index: 5, kind: input, shape index: {}]   ;;  %s5016_s6 = inlined_call_operand.vmem [shape: f32[1,128], index: 6, kind: input, shape index: {}]   ;;  %s5017_s7 = inlined_call_operand.hbm [shape: f32[8,128], index: 7, kind: output, shape index: {0}]   ;;  %s5018_s8 = inlined_call_operand.hbm [shape: f32[1,128], index: 8, kind: output, shape index: {1}]   ;;  %s5019_s9 = inlined_call_operand.hbm [shape: f32[1,128], index: 9, kind: output, shape index: {2}]  }
   0x1   :  { %s3996_s11 = scalar_lea.hbm %s5010_s0, 16 }
   0x2   :  { %p3997_p0 = scmp.ne.s32.totalorder %s5010_s0, %s3996_s11  ;;  %p4000_p1 = scmp.lt.u32.totalorder %s3996_s11, %s5010_s0 }
   0x4   :  { %p4002_p2 = pnand %p4000_p1, %p3997_p0 }
   0x6   :  { %4005 = shalt.err (!%p4002_p2)  }
   0x7   :  { %s4148_s16 = smov [#allocation5]  }
   0x8   :  { %16 = dma.hbm_to_smem %s5010_s0, 16, %s4148_s16, [#allocation4] }
   0x9   :  { %4138 = dma.done.wait [#allocation4], 16 }
   0xa   :  { %4139 = vsyncadd [#allocation4], 4294967280 }
   0xb   :  { %18 = sfence }
   0xc   :  { %19 = vsyncpa [#allocation7], 0 }
   0xd   :  { %20 = vsyncpa [#allocation10], 0 }
   0xe   :  { %21 = vsyncpa [#allocation8], 0 }
   0xf   :  { %22 = vsyncpa [#allocation14], 0  ;;  %s4149_s19 = smov [#allocation9]   ;;  %s4006_s23 = scalar_lea.hbm %s5012_s2, 8192 }
  0x10   :  { %s40_s20 = sshll.u32 %s4149_s19, 4  ;;  %p4007_p3 = scmp.ne.s32.totalorder %s5012_s2, %s4006_s23  ;;  %s41_s20 = int_to_ptr.vmem [resolvable:$true] %s40_s20 }
  0x11   :  { %p4010_p4 = scmp.lt.u32.totalorder %s4006_s23, %s5012_s2 }
  0x13   :  { %p4012_p5 = pnand %p4010_p4, %p4007_p3 }
  0x15   :  { %4015 = shalt.err (!%p4012_p5)
}
  0x16   :  { %s4016_s27 = scalar_lea.vmem %s41_s20, 8192  ;;  %p4021_p7 = scmp.lt.s32.totalorder %s41_s20, %s41_s20 }
  0x17   :  { %p4017_p6 = scmp.ne.s32.totalorder %s41_s20, %s4016_s27  ;;  %p4022_p8 = scmp.lt.s32.totalorder %s4016_s27, %s4016_s27 }
  0x19   :  { %p4023_p9 = por %p4022_p8, %p4021_p7 }
  0x1b   :  { %p4024_p10 = pnand %p4023_p9, %p4017_p6 }
  0x1d   :  { %4027 = shalt.err (!%p4024_p10)
}
  0x1e   :  { %s4150_s28 = smov 512   ;;  %s4151_s29 = smov 32  }
  0x1f   :  { %46 = dma.hbm_to_vmem [thread:$0]  %s5012_s2, 8192, %s41_s20, [#allocation10], %s4150_s28, %s4150_s28, %s4151_s29  }
  0x20   :  { %s4152_s11 = smov [#allocation6]   ;;  %s4028_s15 = scalar_lea.hbm %s5011_s1, 2048 }
  0x21   :  { %s28_s12 = sshll.u32 %s4152_s11, 4  ;;  %p4029_p11 = scmp.ne.s32.totalorder %s5011_s1, %s4028_s15  ;;  %s29_s12 = int_to_ptr.vmem [resolvable:$true] %s28_s12 }
  0x22   :  { %p4032_p12 = scmp.lt.u32.totalorder %s4028_s15, %s5011_s1 }
  0x24   :  { %p4034_p13 = pnand %p4032_p12, %p4029_p11 }
  0x26   :  { %4037 = shalt.err (!%p4034_p13)
}
  0x27   :  { %s4038_s21 = scalar_lea.vmem %s29_s12, 2048  ;;  %p4043_p1 = scmp.lt.s32.totalorder %s29_s12, %s29_s12 }
  0x28   :  { %p4039_p0 = scmp.ne.s32.totalorder %s29_s12, %s4038_s21  ;;  %p4044_p2 = scmp.lt.s32.totalorder %s4038_s21, %s4038_s21 }
  0x2a   :  { %p4045_p3 = por %p4044_p2, %p4043_p1 }
  0x2c   :  { %p4046_p4 = pnand %p4045_p3, %p4039_p0 }
  0x2e   :  { %4049 = shalt.err (!%p4046_p4)
}
  0x2f   :  { %s4153_s2 = smov 128   ;;  %s4154_s20 = smov 8  }
  0x30   :  { %34 = dma.hbm_to_vmem [thread:$0]  %s5011_s1, 2048, %s29_s12, [#allocation7], %s4153_s2, %s4153_s2, %s4154_s20  }
  0x31   :  { %s4155_s24 = smov [#allocation11]   ;;  %s4050_s27 = scalar_lea.hbm %s5013_s3, 8192 }
  0x32   :  { %s52_s25 = sshll.u32 %s4155_s24, 4  ;;  %p4051_p5 = scmp.ne.s32.totalorder %s5013_s3, %s4050_s27  ;;  %s53_s25 = int_to_ptr.vmem [resolvable:$true] %s52_s25 }
  0x33   :  { %p4054_p6 = scmp.lt.u32.totalorder %s4050_s27, %s5013_s3 }
  0x35   :  { %p4056_p7 = pnand %p4054_p6, %p4051_p5 }
  0x37   :  { %4059 = shalt.err (!%p4056_p7)
}
  0x38   :  { %s4060_s14 = scalar_lea.vmem %s53_s25, 8192  ;;  %p4065_p9 = scmp.lt.s32.totalorder %s53_s25, %s53_s25 }
  0x39   :  { %p4061_p8 = scmp.ne.s32.totalorder %s53_s25, %s4060_s14  ;;  %p4066_p10 = scmp.lt.s32.totalorder %s4060_s14, %s4060_s14 }
  0x3b   :  { %p4067_p11 = por %p4066_p10, %p4065_p9 }
  0x3d   :  { %p4068_p12 = pnand %p4067_p11, %p4061_p8 }
  0x3f   :  { %4071 = shalt.err (!%p4068_p12)
}
  0x40   :  { %58 = dma.hbm_to_vmem [thread:$0]  %s5013_s3, 8192, %s53_s25, [#allocation10], %s4150_s28, %s4150_s28, %s4151_s29  }
  0x41   :  { %4140 = dma.done.wait [#allocation7], 2048  }
  0x42   :  { %4141 = vsyncadd [#allocation7], 4294965248 }
  0x43   :  { %4142 = dma.done.wait [#allocation10], 16384  }
  0x44   :  { %4143 = vsyncadd [#allocation10], 4294950912  ;;  %v5020_v0 = vmov 0.0   ;;  %v154_v1 = vld [vmem:[#allocation11 + $0x8] sm:$0xff]  ;;  %v156_v3 = vld [vmem:[#allocation11 + $0x18] sm:$0xff]  ;;  %vm2839_vm0 = vcmask 1040384  }
  0x45   :  { %281 = vmatprep.mubr.f32.mxu0 %v5020_v0  ;;  %352 = vmatprep.mubr.f32.mxu1 %v5020_v0  ;;  %v158_v2 = vld [vmem:[#allocation11 + $0x28] sm:$0xff]  ;;  %v160_v5 = vld [vmem:[#allocation11 + $0x38] sm:$0xff]  ;;  %v153_v6 = vld [vmem:[#allocation11] sm:$0xff]  ;;  %vm2841_vm1 = vcmask 1041408   ;;  %vm2843_vm2 = vcmask 1042432   ;;  %vm2845_vm3 = vcmask 1043456  }
  0x46   :  { %v4266_v4 = vpack.c.bf16 %v158_v2, %v154_v1  ;;  %v157_v7 = vld [vmem:[#allocation11 + $0x20] sm:$0xff]  ;;  %v4268_v8 = vpack.c.bf16 %v160_v5, %v156_v3  ;;  %v155_v10 = vld [vmem:[#allocation11 + $0x10] sm:$0xff]  ;;  %v162_v12 = vld [vmem:[#allocation11 + $0x48] sm:$0xff]  ;;  %vm2847_vm4 = vcmask 1044480   ;;  %vm2849_vm5 = vcmask 1045504   ;;  %s2916_s19 = sld [smem:[#allocation5 + $0x2]] }
  0x47   :  { %v4270_v9 = vpack.c.bf16 %v157_v7, %v153_v6  ;;  %v159_v11 = vld [vmem:[#allocation11 + $0x30] sm:$0xff]  ;;  %v166_v14 = vld [vmem:[#allocation11 + $0x68] sm:$0xff]  ;;  %v164_v15 = vld [vmem:[#allocation11 + $0x58] sm:$0xff]  ;;  %vm2851_vm6 = vcmask 1046528   ;;  %s2920_s2 = sld [smem:[#allocation5 + $0x3]]  ;;  %s2924_s22 = sld [smem:[#allocation5 + $0x4]] }
  0x48   :  { %2941 = vmatprep.subr.bf16.mxu0 %v4266_v4  ;;  %v4273_v13 = vpack.c.bf16 %v159_v11, %v155_v10  ;;  %v168_v16 = vld [vmem:[#allocation11 + $0x78] sm:$0xff]  ;;  %2973 = vmatprep.subr.bf16.mxu1 %v4268_v8  ;;  %v4277_v17 = vpack.c.bf16 %v166_v14, %v162_v12  ;;  %v161_v19 = vld [vmem:[#allocation11 + $0x40] sm:$0xff]  ;;  %v163_v21 = vld [vmem:[#allocation11 + $0x50] sm:$0xff]  ;;  %s2928_s24 = sld [smem:[#allocation5 + $0x5]]  ;;  %s2932_s26 = sld [smem:[#allocation5 + $0x6]] }
  0x49   :  { %2943 = vmatpush1.bf16.msra.mxu0 %v4270_v9  ;;  %v4279_v18 = vpack.c.bf16 %v168_v16, %v164_v15  ;;  %v165_v20 = vld [vmem:[#allocation11 + $0x60] sm:$0xff]  ;;  %v167_v23 = vld [vmem:[#allocation11 + $0x70] sm:$0xff]  ;;  %v170_v24 = vld [vmem:[#allocation11 + $0x88] sm:$0xff]  ;;  %s2936_s27 = sld [smem:[#allocation5 + $0x7]]  ;;  %s4157_s10 = smov [#allocation13]  }
  0x4a   :  { %2975 = vmatpush1.bf16.msra.mxu1 %v4273_v13  ;;  %v4282_v22 = vpack.c.bf16 %v165_v20, %v161_v19  ;;  %v174_v25 = vld [vmem:[#allocation11 + $0xa8] sm:$0xff]  ;;  %2945 = vmatprep.subr.bf16.mxu0 %v4277_v17  ;;  %v4286_v26 = vpack.c.bf16 %v167_v23, %v163_v21  ;;  %v172_v28 = vld [vmem:[#allocation11 + $0x98] sm:$0xff]  ;;  %v169_v30 = vld [vmem:[#allocation11 + $0x80] sm:$0xff]  ;;  %s2874_s11 = sshll.u32 %s4157_s10, 4  ;;  %s4158_s13 = smov [#allocation12]   ;;  %s2875_s11 = int_to_ptr.vmem [resolvable:$true] %s2874_s11 }
  0x4b   :  { %2977 = vmatprep.subr.bf16.mxu1 %v4279_v18  ;;  %v4288_v27 = vpack.c.bf16 %v174_v25, %v170_v24  ;;  %v176_v29 = vld [vmem:[#allocation11 + $0xb8] sm:$0xff]  ;;  %v173_v32 = vld [vmem:[#allocation11 + $0xa0] sm:$0xff]  ;;  %v171_v33 = vld [vmem:[#allocation11 + $0x90] sm:$0xff]  ;;  %s2864_s14 = sshll.u32 %s4158_s13, 4  ;;  %s4072_s1 = scalar_lea.vmem %s2875_s11, 16  ;;  %s2865_s14 = int_to_ptr.vmem [resolvable:$true] %s2864_s14 }
  0x4c   :  { %v4290_v31 = vpack.c.bf16 %v176_v29, %v172_v28  ;;  %v175_v34 = vld [vmem:[#allocation11 + $0xb0] sm:$0xff]  ;;  %v4293_v35 = vpack.c.bf16 %v173_v32, %v169_v30  ;;  %v178_v36 = vld [vmem:[#allocation11 + $0xc8] sm:$0xff]  ;;  %v180_v38 = vld [vmem:[#allocation11 + $0xd8] sm:$0xff]  ;;  %s882_s21 = scalar_lea.vmem [#allocation6], %s2916_s19  ;;  %p4073_p13 = scmp.ne.s32.totalorder %s2875_s11, %s4072_s1 }
  0x4d   :  { %2947 = vmatpush1.bf16.msra.mxu0 %v4282_v22  ;;  %v182_v37 = vld [vmem:[#allocation11 + $0xe8] sm:$0xff]  ;;  %v4297_v39 = vpack.c.bf16 %v175_v34, %v171_v33  ;;  %v184_v41 = vld [vmem:[#allocation11 + $0xf8] sm:$0xff]  ;;  %v177_v42 = vld [vmem:[#allocation11 + $0xc0] sm:$0xff]  ;;  %s1205_s20 = scalar_lea.vmem [#allocation6], %s2920_s2  ;;  %s1528_s23 = scalar_lea.vmem [#allocation6], %s2924_s22 }
  0x4e   :  { %2979 = vmatpush1.bf16.msra.mxu1 %v4286_v26  ;;  %2949 = vmatprep.subr.bf16.mxu0 %v4288_v27  ;;  %v4299_v40 = vpack.c.bf16 %v182_v37, %v178_v36  ;;  %v181_v43 = vld [vmem:[#allocation11 + $0xe0] sm:$0xff]  ;;  %v4302_v44 = vpack.c.bf16 %v184_v41, %v180_v38  ;;  %v179_v45 = vld [vmem:[#allocation11 + $0xd0] sm:$0xff]  ;;  %v186_v47 = vld [vmem:[#allocation11 + $0x108] sm:$0xff]  ;;  %s1851_s25 = scalar_lea.vmem [#allocation6], %s2928_s24  ;;  %s2174_s0 = scalar_lea.vmem [#allocation6], %s2932_s26 }
  0x4f   :  { %2981 = vmatprep.subr.bf16.mxu1 %v4290_v31  ;;  %v183_v46 = vld [vmem:[#allocation11 + $0xf0] sm:$0xff]  ;;  %v190_v48 = vld [vmem:[#allocation11 + $0x128] sm:$0xff]  ;;  %v188_v49 = vld [vmem:[#allocation11 + $0x118] sm:$0xff]  ;;  %v4305_v51 = vpack.c.bf16 %v181_v43, %v177_v42  ;;  %s2497_s30 = scalar_lea.vmem [#allocation6], %s2936_s27  ;;  %s4076_s12 = scalar_lea.vmem %s2875_s11, 32 }
  0x50   :  { %v192_v50 = vld [vmem:[#allocation11 + $0x138] sm:$0xff]  ;;  %v4309_v52 = vpack.c.bf16 %v183_v46, %v179_v45  ;;  %v4311_v53 = vpack.c.bf16 %v190_v48, %v186_v47  ;;  %v185_v54 = vld [vmem:[#allocation11 + $0x100] sm:$0xff]  ;;  %v187_v56 = vld [vmem:[#allocation11 + $0x110] sm:$0xff]  ;;  %p4077_p0 = scmp.lt.s32.totalorder %s2875_s11, %s2875_s11  ;;  %p4078_p1 = scmp.lt.s32.totalorder %s4076_s12, %s4072_s1 }
  0x51   :  { %2951 = vmatpush1.bf16.msra.mxu0 %v4293_v35  ;;  %v189_v55 = vld [vmem:[#allocation11 + $0x120] sm:$0xff]  ;;  %v4314_v57 = vpack.c.bf16 %v192_v50, %v188_v49  ;;  %v191_v58 = vld [vmem:[#allocation11 + $0x130] sm:$0xff]  ;;  %v194_v59 = vld [vmem:[#allocation11 + $0x148] sm:$0xff] }
  0x52   :  { %2983 = vmatpush1.bf16.msra.mxu1 %v4297_v39  ;;  %2953 = vmatprep.subr.bf16.mxu0 %v4299_v40  ;;  %v198_v60 = vld [vmem:[#allocation11 + $0x168] sm:$0xff]  ;;  %v196_v61 = vld [vmem:[#allocation11 + $0x158] sm:$0xff]  ;;  %v4317_v63 = vpack.c.bf16 %v189_v55, %v185_v54  ;;  %v4321_v1 = vpack.c.bf16 %v191_v58, %v187_v56  ;;  %v193_v3 = vld [vmem:[#allocation11 + $0x140] sm:$0xff]  ;;  %p4079_p2 = por %p4078_p1, %p4077_p0 }
  0x53   :  { %2985 = vmatprep.subr.bf16.mxu1 %v4302_v44  ;;  %v200_v62 = vld [vmem:[#allocation11 + $0x178] sm:$0xff]  ;;  %v4323_v2 = vpack.c.bf16 %v198_v60, %v194_v59  ;;  %v197_v5 = vld [vmem:[#allocation11 + $0x160] sm:$0xff]  ;;  %v195_v6 = vld [vmem:[#allocation11 + $0x150] sm:$0xff] }
  0x54   :  { %v4326_v7 = vpack.c.bf16 %v200_v62, %v196_v61  ;;  %v199_v10 = vld [vmem:[#allocation11 + $0x170] sm:$0xff]  ;;  %v202_v11 = vld [vmem:[#allocation11 + $0x188] sm:$0xff]  ;;  %v204_v14 = vld [vmem:[#allocation11 + $0x198] sm:$0xff]  ;;  %v4329_v16 = vpack.c.bf16 %v197_v5, %v193_v3  ;;  %p4080_p3 = pnand %p4079_p2, %p4073_p13 }
  0x55   :  { %2955 = vmatpush1.bf16.msra.mxu0 %v4305_v51  ;;  %v206_v12 = vld [vmem:[#allocation11 + $0x1a8] sm:$0xff]  ;;  %v208_v15 = vld [vmem:[#allocation11 + $0x1b8] sm:$0xff]  ;;  %v201_v19 = vld [vmem:[#allocation11 + $0x180] sm:$0xff]  ;;  %v4333_v20 = vpack.c.bf16 %v199_v10, %v195_v6 }
  0x56   :  { %2987 = vmatpush1.bf16.msra.mxu1 %v4309_v52  ;;  %2957 = vmatprep.subr.bf16.mxu0 %v4311_v53  ;;  %5081 = vst [vmem:[#allocation21_spill] sm:$0xff] %v4326_v7  ;;  %5082 = vst [vmem:[#allocation22_spill] sm:$0xff] %v4329_v16  ;;  %v4335_v21 = vpack.c.bf16 %v206_v12, %v202_v11  ;;  %v205_v23 = vld [vmem:[#allocation11 + $0x1a0] sm:$0xff]  ;;  %v203_v24 = vld [vmem:[#allocation11 + $0x190] sm:$0xff]  ;;  %v4338_v28 = vpack.c.bf16 %v208_v15, %v204_v14 }
  0x57   :  { %2989 = vmatprep.subr.bf16.mxu1 %v4314_v57  ;;  %5083 = vst [vmem:[#allocation23_spill] sm:$0xff] %v4333_v20  ;;  %v207_v25 = vld [vmem:[#allocation11 + $0x1b0] sm:$0xff]  ;;  %v210_v29 = vld [vmem:[#allocation11 + $0x1c8] sm:$0xff]  ;;  %v212_v33 = vld [vmem:[#allocation11 + $0x1d8] sm:$0xff]  ;;  %v4344_v36 = vpack.c.bf16 %v205_v23, %v201_v19 }
  0x58   :  { %5084 = vst [vmem:[#allocation24_spill] sm:$0xff] %v4335_v21  ;;  %5085 = vst [vmem:[#allocation25_spill] sm:$0xff] %v4338_v28  ;;  %v214_v30 = vld [vmem:[#allocation11 + $0x1e8] sm:$0xff]  ;;  %v78_v32 = vld [vmem:[%s5015_s5] sm:$0x1]  ;;  %v4348_v37 = vpack.c.bf16 %v207_v25, %v203_v24  ;;  %s4426_s5 = sld [smem:[#allocation5]] }
  0x59   :  { %2959 = vmatpush1.bf16.msra.mxu0 %v4317_v63  ;;  %v216_v34 = vld [vmem:[#allocation11 + $0x1f8] sm:$0xff]  ;;  %79 = vst [vmem:[#allocation2] sm:$0x1] %v78_v32  ;;  %5086 = vst [vmem:[#allocation26_spill] sm:$0xff] %v4344_v36  ;;  %v4350_v38 = vpack.c.bf16 %v214_v30, %v210_v29  ;;  %v209_v41 = vld [vmem:[#allocation11 + $0x1c0] sm:$0xff] }
  0x5a   :  { %2991 = vmatpush1.bf16.msra.mxu1 %v4321_v1  ;;  %2961 = vmatprep.subr.bf16.mxu0 %v4323_v2  ;;  %5087 = vst [vmem:[#allocation27_spill] sm:$0xff] %v4348_v37  ;;  %v213_v42 = vld [vmem:[#allocation11 + $0x1e0] sm:$0xff]  ;;  %v211_v43 = vld [vmem:[#allocation11 + $0x1d0] sm:$0xff]  ;;  %v4353_v45 = vpack.c.bf16 %v216_v34, %v212_v33  ;;  %v90_v47 = vld [vmem:[#allocation9 + $0x8] sm:$0xff] }
  0x5b   :  { %2993 = vmatprep.subr.bf16.mxu1 %v4326_v7  ;;  %5088 = vst [vmem:[#allocation28_spill] sm:$0xff] %v4350_v38  ;;  %v215_v46 = vld [vmem:[#allocation11 + $0x1f0] sm:$0xff]  ;;  %v94_v48 = vld [vmem:[#allocation9 + $0x28] sm:$0xff]  ;;  %v92_v49 = vld [vmem:[#allocation9 + $0x18] sm:$0xff]  ;;  %v4356_v54 = vpack.c.bf16 %v213_v42, %v209_v41 }
  0x5c   :  { %5089 = vst [vmem:[#allocation29_spill] sm:$0xff] %v4353_v45  ;;  %v96_v50 = vld [vmem:[#allocation9 + $0x38] sm:$0xff]  ;;  %v4360_v55 = vpack.c.bf16 %v215_v46, %v211_v43  ;;  %v4362_v56 = vpack.c.bf16 %v94_v48, %v90_v47  ;;  %v89_v58 = vld [vmem:[#allocation9] sm:$0xff]  ;;  %v91_v60 = vld [vmem:[#allocation9 + $0x10] sm:$0xff] }
  0x5d   :  { %2963 = vmatpush1.bf16.msra.mxu0 %v4329_v16  ;;  %5090 = vst [vmem:[#allocation30_spill] sm:$0xff] %v4356_v54  ;;  %v93_v59 = vld [vmem:[#allocation9 + $0x20] sm:$0xff]  ;;  %v4365_v61 = vpack.c.bf16 %v96_v50, %v92_v49  ;;  %v95_v62 = vld [vmem:[#allocation9 + $0x30] sm:$0xff]  ;;  %v98_v3 = vld [vmem:[#allocation9 + $0x48] sm:$0xff] }
  0x5e   :  { %2995 = vmatpush1.bf16.msra.mxu1 %v4333_v20  ;;  %2965 = vmatprep.subr.bf16.mxu0 %v4335_v21  ;;  %5091 = vst [vmem:[#allocation31_spill] sm:$0xff] %v4360_v55  ;;  %5092 = vst [vmem:[#allocation32_spill] sm:$0xff] %v4362_v56  ;;  %v102_v5 = vld [vmem:[#allocation9 + $0x68] sm:$0xff]  ;;  %v100_v6 = vld [vmem:[#allocation9 + $0x58] sm:$0xff]  ;;  %v4368_v12 = vpack.c.bf16 %v93_v59, %v89_v58  ;;  %v4372_v14 = vpack.c.bf16 %v95_v62, %v91_v60  ;;  %s86_s29 = scalar_lea.vmem [#allocation6], %s4426_s5 }
  0x5f   :  { %2997 = vmatprep.subr.bf16.mxu1 %v4338_v28  ;;  %5093 = vst [vmem:[#allocation33_spill] sm:$0xff] %v4365_v61  ;;  %v104_v10 = vld [vmem:[#allocation9 + $0x78] sm:$0xff]  ;;  %v4374_v15 = vpack.c.bf16 %v102_v5, %v98_v3  ;;  %v97_v19 = vld [vmem:[#allocation9 + $0x40] sm:$0xff]  ;;  %v99_v24 = vld [vmem:[#allocation9 + $0x50] sm:$0xff] }
  0x60   :  { %v82_v11 = vld [vmem:[#allocation2] sm:$0x1]  ;;  %v101_v23 = vld [vmem:[#allocation9 + $0x60] sm:$0xff]  ;;  %v4377_v25 = vpack.c.bf16 %v104_v10, %v100_v6  ;;  %v103_v29 = vld [vmem:[#allocation9 + $0x70] sm:$0xff] }
  0x61   :  { %2967 = vmatpush1.bf16.msra.mxu0 %v4344_v36  ;;  %5094 = vst [vmem:[#allocation34_spill] sm:$0xff] %v4374_v15  ;;  %v106_v30 = vld [vmem:[#allocation9 + $0x88] sm:$0xff]  ;;  %v108_v33 = vld [vmem:[#allocation9 + $0x98] sm:$0xff]  ;;  %v4380_v41 = vpack.c.bf16 %v101_v23, %v97_v19  ;;  %v4384_v42 = vpack.c.bf16 %v103_v29, %v99_v24  ;;  %v105_v46 = vld [vmem:[#allocation9 + $0x80] sm:$0xff] }
  0x62   :  { %2999 = vmatpush1.bf16.msra.mxu1 %v4348_v37  ;;  %2969 = vmatprep.subr.bf16.mxu0 %v4350_v38  ;;  %v110_v32 = vld [vmem:[#allocation9 + $0xa8] sm:$0xff]  ;;  %v112_v34 = vld [vmem:[#allocation9 + $0xb8] sm:$0xff]  ;;  %v109_v47 = vld [vmem:[#allocation9 + $0xa0] sm:$0xff] }
  0x63   :  { %3001 = vmatprep.subr.bf16.mxu1 %v4353_v45  ;;  %v4386_v43 = vpack.c.bf16 %v110_v32, %v106_v30  ;;  %v107_v48 = vld [vmem:[#allocation9 + $0x90] sm:$0xff]  ;;  %v4389_v49 = vpack.c.bf16 %v112_v34, %v108_v33  ;;  %v114_v58 = vld [vmem:[#allocation9 + $0xc8] sm:$0xff]  ;;  %v116_v60 = vld [vmem:[#allocation9 + $0xd8] sm:$0xff]  ;;  %v4394_v3 = vpack.c.bf16 %v109_v47, %v105_v46 }
  0x64   :  { %v111_v50 = vld [vmem:[#allocation9 + $0xb0] sm:$0xff]  ;;  %v118_v59 = vld [vmem:[#allocation9 + $0xe8] sm:$0xff]  ;;  %v120_v62 = vld [vmem:[#allocation9 + $0xf8] sm:$0xff] }
  0x65   :  { %2971 = vmatpush1.bf16.msra.mxu0 %v4356_v54  ;;  %5095 = vst [vmem:[#allocation35_spill] sm:$0xff] %v4386_v43  ;;  %5096 = vst [vmem:[#allocation36_spill] sm:$0xff] %v4389_v49  ;;  %v4398_v5 = vpack.c.bf16 %v111_v50, %v107_v48  ;;  %v4400_v6 = vpack.c.bf16 %v118_v59, %v114_v58  ;;  %v113_v10 = vld [vmem:[#allocation9 + $0xc0] sm:$0xff]  ;;  %v115_v19 = vld [vmem:[#allocation9 + $0xd0] sm:$0xff]  ;;  %v4403_v23 = vpack.c.bf16 %v120_v62, %v116_v60 }
  0x66   :  { %3003 = vmatpush1.bf16.msra.mxu1 %v4360_v55  ;;  %3005 = vmatprep.subr.bf16.mxu0 %v4362_v56  ;;  %5097 = vst [vmem:[#allocation37_spill] sm:$0xff] %v4394_v3  ;;  %v119_v24 = vld [vmem:[#allocation9 + $0xf0] sm:$0xff]  ;;  %v122_v29 = vld [vmem:[#allocation9 + $0x108] sm:$0xff]  ;;  %v124_v32 = vld [vmem:[#allocation9 + $0x118] sm:$0xff] }
  0x67   :  { %3037 = vmatprep.subr.bf16.mxu1 %v4365_v61  ;;  %5098 = vst [vmem:[#allocation38_spill] sm:$0xff] %v4398_v5  ;;  %5099 = vst [vmem:[#allocation39_spill] sm:$0xff] %v4400_v6  ;;  %v126_v30 = vld [vmem:[#allocation9 + $0x128] sm:$0xff]  ;;  %v128_v33 = vld [vmem:[#allocation9 + $0x138] sm:$0xff]  ;;  %v4410_v46 = vpack.c.bf16 %v119_v24, %v115_v19 }
  0x68   :  { %282 = vmatmul.mubr.f32.vlgmr.msra.gmra.mrb[0].mxu0 %v82_v11  ;;  %5100 = vst [vmem:[#allocation40_spill] sm:$0xff] %v4403_v23  ;;  %v4412_v47 = vpack.c.bf16 %v126_v30, %v122_v29  ;;  %v121_v48 = vld [vmem:[#allocation9 + $0x100] sm:$0xff]  ;;  %v123_v58 = vld [vmem:[#allocation9 + $0x110] sm:$0xff]  ;;  %v4415_v59 = vpack.c.bf16 %v128_v33, %v124_v32  ;;  %v130_v62 = vld [vmem:[#allocation9 + $0x148] sm:$0xff] }
  0x69   :  { %353 = vmatmul.mubr.f32.vlgmr.msra.gmra.mrb[0].mxu1 %v82_v11  ;;  %3007 = vmatpush1.bf16.msra.mxu0 %v4368_v12  ;;  %v117_v11 = vld [vmem:[#allocation9 + $0xe0] sm:$0xff]  ;;  %5102 = vst [vmem:[#allocation42_spill] sm:$0xff] %v4410_v46  ;;  %v127_v60 = vld [vmem:[#allocation9 + $0x130] sm:$0xff] }
  0x6a   :  { %3039 = vmatpush1.bf16.msra.mxu1 %v4372_v14  ;;  %3009 = vmatprep.subr.bf16.mxu0 %v4374_v15  ;;  %v4406_v34 = vpack.c.bf16 %v117_v11, %v113_v10  ;;  %5103 = vst [vmem:[#allocation43_spill] sm:$0xff] %v4412_v47  ;;  %v125_v50 = vld [vmem:[#allocation9 + $0x120] sm:$0xff]  ;;  %5104 = vst [vmem:[#allocation44_spill] sm:$0xff] %v4415_v59  ;;  %v132_v10 = vld [vmem:[#allocation9 + $0x158] sm:$0xff]  ;;  %v4422_v19 = vpack.c.bf16 %v127_v60, %v123_v58 }
  0x6b   :  { %3041 = vmatprep.subr.bf16.mxu1 %v4377_v25  ;;  %423 = vmatprep.mubr.f32.mxu0 %v5020_v0  ;;  %v136_v11 = vld [vmem:[#allocation9 + $0x178] sm:$0xff]  ;;  %v129_v29 = vld [vmem:[#allocation9 + $0x140] sm:$0xff]  ;;  %v131_v32 = vld [vmem:[#allocation9 + $0x150] sm:$0xff] }
  0x6c   :  { %494 = vmatprep.mubr.f32.mxu1 %v5020_v0  ;;  %5101 = vst [vmem:[#allocation41_spill] sm:$0xff] %v4406_v34  ;;  %v134_v0 = vld [vmem:[#allocation9 + $0x168] sm:$0xff]  ;;  %v133_v30 = vld [vmem:[#allocation9 + $0x160] sm:$0xff]  ;;  %v4429_v33 = vpack.c.bf16 %v136_v11, %v132_v10  ;;  %v139_v11 = vld [vmem:[#allocation9 + $0x190] sm:$0xff] }
  0x6d   :  { %3011 = vmatpush1.bf16.msra.mxu0 %v4380_v41  ;;  %v4424_v24 = vpack.c.bf16 %v134_v0, %v130_v62  ;;  %v4432_v58 = vpack.c.bf16 %v133_v30, %v129_v29  ;;  %v137_v62 = vld [vmem:[#allocation9 + $0x180] sm:$0xff]  ;;  %v148_v29 = vld [vmem:[#allocation9 + $0x1d8] sm:$0xff] }
  0x6e   :  { %3043 = vmatpush1.bf16.msra.mxu1 %v4384_v42  ;;  %3013 = vmatprep.subr.bf16.mxu0 %v4386_v43  ;;  %5107 = vst [vmem:[#allocation47_spill] sm:$0xff] %v4429_v33  ;;  %v141_v10 = vld [vmem:[#allocation9 + $0x1a0] sm:$0xff]  ;;  %v152_v30 = vld [vmem:[#allocation9 + $0x1f8] sm:$0xff] }
  0x6f   :  { %3045 = vmatprep.subr.bf16.mxu1 %v4389_v49  ;;  %5106 = vst [vmem:[#allocation46_spill] sm:$0xff] %v4424_v24 }
  0x71   :  { %3015 = vmatpush1.bf16.msra.mxu0 %v4394_v3 }
  0x72   :  { %3047 = vmatpush1.bf16.msra.mxu1 %v4398_v5  ;;  %3017 = vmatprep.subr.bf16.mxu0 %v4400_v6  ;;  %v4418_v5 = vpack.c.bf16 %v125_v50, %v121_v48  ;;  %v138_v48 = vld [vmem:[#allocation9 + $0x188] sm:$0xff] }
  0x73   :  { %3049 = vmatprep.subr.bf16.mxu1 %v4403_v23  ;;  %v142_v50 = vld [vmem:[#allocation9 + $0x1a8] sm:$0xff]  ;;  %v140_v23 = vld [vmem:[#allocation9 + $0x198] sm:$0xff] }
  0x74   :  { %5105 = vst [vmem:[#allocation45_spill] sm:$0xff] %v4418_v5  ;;  %v4438_v60 = vpack.c.bf16 %v142_v50, %v138_v48  ;;  %v146_v6 = vld [vmem:[#allocation9 + $0x1c8] sm:$0xff]  ;;  %v4453_v48 = vpack.c.bf16 %v152_v30, %v148_v29  ;;  %v147_v50 = vld [vmem:[#allocation9 + $0x1d0] sm:$0xff] }
  0x75   :  { %3019 = vmatpush1.bf16.msra.mxu0 %v4406_v34  ;;  %v135_v34 = vld [vmem:[#allocation9 + $0x170] sm:$0xff] }
  0x76   :  { %3051 = vmatpush1.bf16.msra.mxu1 %v4410_v46  ;;  %3021 = vmatprep.subr.bf16.mxu0 %v4412_v47  ;;  %v144_v46 = vld [vmem:[#allocation9 + $0x1b8] sm:$0xff]  ;;  %v4436_v0 = vpack.c.bf16 %v135_v34, %v131_v32  ;;  %v143_v47 = vld [vmem:[#allocation9 + $0x1b0] sm:$0xff] }
  0x77   :  { %3053 = vmatprep.subr.bf16.mxu1 %v4415_v59  ;;  %v4441_v59 = vpack.c.bf16 %v144_v46, %v140_v23  ;;  %v4448_v34 = vpack.c.bf16 %v143_v47, %v139_v11  ;;  %v145_v23 = vld [vmem:[#allocation9 + $0x1c0] sm:$0xff]  ;;  %v5108_v47 = vmov 0.0   ;;  %v503_v11 = vlaneseq }
  0x78   :  { %v149_v46 = vld [vmem:[#allocation9 + $0x1e0] sm:$0xff] }
  0x79   :  { %3023 = vmatpush1.bf16.msra.mxu0 %v4418_v5  ;;  %v150_v5 = vld [vmem:[#allocation9 + $0x1e8] sm:$0xff]  ;;  %v504_v29 = vshrl.u32 %v503_v11, 7 }
  0x7a   :  { %3055 = vmatpush1.bf16.msra.mxu1 %v4422_v19  ;;  %3025 = vmatprep.subr.bf16.mxu0 %v4424_v24  ;;  %v4444_v24 = vpack.c.bf16 %v141_v10, %v137_v62  ;;  %v4450_v32 = vpack.c.bf16 %v150_v5, %v146_v6  ;;  %v4456_v62 = vpack.c.bf16 %v149_v46, %v145_v23  ;;  %v87_v10 = vld [vmem:[%s86_s29] sm:$0x1] }
  0x7b   :  { %3057 = vmatprep.subr.bf16.mxu1 %v4429_v33  ;;  %v151_v33 = vld [vmem:[#allocation9 + $0x1f0] sm:$0xff]  ;;  %v88_v6 = vmax.f32 %v87_v10, 0.0  ;;  %v505_v30 = vsub.s32 0, %v504_v29  ;;  %v509_v46 = vsub.s32 1, %v504_v29  ;;  %v513_v11 = vsub.s32 2, %v504_v29 }
  0x7c   :  { %v4461_v5 = vpack.c.bf16 %v151_v33, %v147_v50  ;;  %v80_v33 = vld [vmem:[%s5016_s6] sm:$0x1] }
  0x7d   :  { %3027 = vmatpush1.bf16.msra.mxu0 %v4432_v58  ;;  %81 = vst [vmem:[#allocation3] sm:$0x1] %v80_v33  ;;  %v501_v23 = vld [vmem:[%s5014_s4] sm:$0xf]  ;;  %s2912_s4 = sld [smem:[#allocation5 + $0x1]] }
  0x7e   :  { %3059 = vmatpush1.bf16.msra.mxu1 %v4436_v0  ;;  %3029 = vmatprep.subr.bf16.mxu0 %v4438_v60  ;;  %v506_v50 = vrot.slane %v501_v23, %v505_v30  ;;  %v510_v10 = vrot.slane %v501_v23, %v509_v46 }
  0x7f   :  { %3061 = vmatprep.subr.bf16.mxu1 %v4441_v59 }
  0x81   :  { %3031 = vmatpush1.bf16.msra.mxu0 %v4444_v24 }
  0x82   :  { %3063 = vmatpush1.bf16.msra.mxu1 %v4448_v34  ;;  %3033 = vmatprep.subr.bf16.mxu0 %v4450_v32 }
  0x83   :  { %3065 = vmatprep.subr.bf16.mxu1 %v4453_v48  ;;  %s559_s6 = scalar_lea.vmem [#allocation6], %s2912_s4 }
  0x85   :  { %3035 = vmatpush1.bf16.msra.mxu0 %v4456_v62 }
  0x86   :  { %3067 = vmatpush1.bf16.msra.mxu1 %v4461_v5  ;;  %3069 = vmatprep.subr.bf16.mxu0 %v4266_v4 }
  0x87   :  { %3101 = vmatprep.subr.bf16.mxu1 %v4268_v8 }
  0x88   :  { %424 = vmatmul.mubr.f32.vlgmr.msra.gmra.mrb[0].mxu0 %v88_v6 }
  0x89   :  { %495 = vmatmul.mubr.f32.vlgmr.msra.gmra.mrb[0].mxu1 %v88_v6  ;;  %3071 = vmatpush1.bf16.msra.mxu0 %v4270_v9 }
  0x8a   :  { %3103 = vmatpush1.bf16.msra.mxu1 %v4273_v13  ;;  %3073 = vmatprep.subr.bf16.mxu0 %v4277_v17 }
  0x8b   :  { %3105 = vmatprep.subr.bf16.mxu1 %v4279_v18  ;;  %626 = vmatprep.mubr.f32.mxu0 %v5108_v47 }
  0x8c   :  { %697 = vmatprep.mubr.f32.mxu1 %v5108_v47 }
  0x8d   :  { %3075 = vmatpush1.bf16.msra.mxu0 %v4282_v22 }
  0x8e   :  { %3107 = vmatpush1.bf16.msra.mxu1 %v4286_v26  ;;  %3077 = vmatprep.subr.bf16.mxu0 %v4288_v27 }
  0x8f   :  { %3109 = vmatprep.subr.bf16.mxu1 %v4290_v31 }
  0x91   :  { %3079 = vmatpush1.bf16.msra.mxu0 %v4293_v35 }
  0x92   :  { %3111 = vmatpush1.bf16.msra.mxu1 %v4297_v39  ;;  %3081 = vmatprep.subr.bf16.mxu0 %v4299_v40 }
  0x93   :  { %3113 = vmatprep.subr.bf16.mxu1 %v4302_v44 }
  0x95   :  { %3083 = vmatpush1.bf16.msra.mxu0 %v4305_v51 }
  0x96   :  { %3115 = vmatpush1.bf16.msra.mxu1 %v4309_v52  ;;  %3085 = vmatprep.subr.bf16.mxu0 %v4311_v53 }
  0x97   :  { %3117 = vmatprep.subr.bf16.mxu1 %v4314_v57 }
  0x99   :  { %3087 = vmatpush1.bf16.msra.mxu0 %v4317_v63 }
  0x9a   :  { %3119 = vmatpush1.bf16.msra.mxu1 %v4321_v1  ;;  %3089 = vmatprep.subr.bf16.mxu0 %v4323_v2 }
  0x9b   :  { %3121 = vmatprep.subr.bf16.mxu1 %v4326_v7 }
  0x9d   :  { %3091 = vmatpush1.bf16.msra.mxu0 %v4329_v16 }
  0x9e   :  { %3123 = vmatpush1.bf16.msra.mxu1 %v4333_v20  ;;  %3093 = vmatprep.subr.bf16.mxu0 %v4335_v21  ;;  %v514_v21 = vrot.slane %v501_v23, %v513_v11 }
  0x9f   :  { %3125 = vmatprep.subr.bf16.mxu1 %v4338_v28 }
  0xa1   :  { %3095 = vmatpush1.bf16.msra.mxu0 %v4344_v36 }
  0xa2   :  { %3127 = vmatpush1.bf16.msra.mxu1 %v4348_v37  ;;  %3097 = vmatprep.subr.bf16.mxu0 %v4350_v38 }
  0xa3   :  { %3129 = vmatprep.subr.bf16.mxu1 %v4353_v45 }
  0xa5   :  { %3099 = vmatpush1.bf16.msra.mxu0 %v4356_v54 }
  0xa6   :  { %3131 = vmatpush1.bf16.msra.mxu1 %v4360_v55  ;;  %3133 = vmatprep.subr.bf16.mxu0 %v4362_v56  ;;  %v517_v55 = vsub.s32 3, %v504_v29 }
  0xa7   :  { %3165 = vmatprep.subr.bf16.mxu1 %v4365_v61 }
  0xa8   :  { %v518_v33 = vrot.slane %v501_v23, %v517_v55 }
 0x15b   :  { %v425_v6 = vpop.f32.mrb[0].mxu0 }
 0x15c   :  { %v523_v56 = vadd.f32 %v506_v50, %v425_v6  ;;  %v496_v54 = vpop.f32.mrb[0].mxu1  ;;  %v427_v61 = vpop.f32.mrb[1].mxu0 }
 0x15d   :  { %v524_v45 = vadd.f32 %v510_v10, %v427_v61  ;;  %v498_v38 = vpop.f32.mrb[1].mxu1  ;;  %v525_v16 = vadd.f32 %v514_v21, %v496_v54 }
 0x15e   :  { %v2909_v37 = vmul.f32 -1.442695, %v523_v56  ;;  %v526_v28 = vadd.f32 %v518_v33, %v498_v38  ;;  %v83_v56 = vld [vmem:[#allocation3] sm:$0x1] }
 0x15f   :  { %v2910_v36 = vmul.f32 -1.442695, %v524_v45 }
 0x160   :  { %3980 = vpow2.f32 %v2909_v37  ;;  %v2911_v20 = vmul.f32 -1.442695, %v526_v28 }
 0x161   :  { %3982 = vpow2.f32 %v2910_v36 }
 0x162   :  { %3984 = vpow2.f32 %v2911_v20 }
 0x163   :  { %3986 = vtanh.f32 %v525_v16 }
 0x16a   :  { %v3981_v7 = vpop.eup %3980 }
 0x16b   :  { %v3983_v30 = vpop.eup %3982  ;;  %v530_v46 = vadd.f32 1.0, %v3981_v7 }
 0x16c   :  { %v536_v50 = vadd.f32 1.0, %v3983_v30  ;;  %v3985_v61 = vpop.eup %3984 }
 0x16d   :  { %3988 = vrcp.f32 %v530_v46  ;;  %v3987_v10 = vpop.eup %3986  ;;  %v543_v29 = vadd.f32 1.0, %v3985_v61 }
 0x16e   :  { %3990 = vrcp.f32 %v536_v50 }
 0x16f   :  { %3992 = vrcp.f32 %v543_v29  ;;  %v5111_v29 = vld [vmem:[#allocation40_spill] sm:$0xff] }
 0x177   :  { %v3989_v45 = vpop.eup %3988 }
 0x178   :  { %v3991_v55 = vpop.eup %3990  ;;  %v547_v37 = vmul.f32 %v3989_v45, %v3987_v10 }
 0x179   :  { %v546_v36 = vmul.f32 %v3991_v55, %v83_v56  ;;  %v3993_v21 = vpop.eup %3992  ;;  %v5109_v55 = vld [vmem:[#allocation38_spill] sm:$0xff] }
 0x17b   :  { %v548_v38 = vadd.f32 %v547_v37, %v546_v36  ;;  %v5110_v37 = vld [vmem:[#allocation39_spill] sm:$0xff]  ;;  %v5112_v36 = vld [vmem:[#allocation41_spill] sm:$0xff] }
 0x17d   :  { %3994 = vtanh.f32 %v548_v38  ;;  %2855 = vst [vmem:[#allocation3] sm:$0x1] %v548_v38  ;;  %2857 = vst [vmem:[#allocation15] sm:$0x1] %v548_v38  ;;  %v5113_v38 = vld [vmem:[#allocation42_spill] sm:$0xff] }
 0x187   :  { %v3995_v7 = vpop.eup %3994 }
 0x188   :  { %v4508_v20 = vmul.f32 %v3995_v7, %v3993_v21  ;;  %v5114_v21 = vld [vmem:[#allocation43_spill] sm:$0xff]  ;;  %v5115_v7 = vld [vmem:[#allocation44_spill] sm:$0xff] }
 0x18a   :  { %2854 = vst [vmem:[#allocation2] sm:$0x1] %v4508_v20  ;;  %2856 = vst [vmem:[#allocation13] sm:$0x1] %v4508_v20  ;;  %627 = vmatmul.mubr.f32.vlgmr.msra.gmra.mrb[2].mxu0 %v4508_v20  ;;  %698 = vmatmul.mubr.f32.vlgmr.msra.gmra.mrb[2].mxu1 %v4508_v20  ;;  %v2819_v16 = vrot.slane %v4508_v20, 7  ;;  %v2822_v28 = vrot.slane %v4508_v20, 6 }
 0x18b   :  { %3135 = vmatpush1.bf16.msra.mxu0 %v4368_v12  ;;  %3167 = vmatpush1.bf16.msra.mxu1 %v4372_v14  ;;  %v2825_v54 = vrot.slane %v4508_v20, 5  ;;  %v2828_v6 = vrot.slane %v4508_v20, 4  ;;  %v2831_v11 = vrot.slane %v4508_v20, 3  ;;  %v2834_v46 = vrot.slane %v4508_v20, 2 }
 0x18c   :  { %3137 = vmatprep.subr.bf16.mxu0 %v4374_v15  ;;  %3169 = vmatprep.subr.bf16.mxu1 %v4377_v25  ;;  %v2840_v23 = vsel %vm2839_vm0, %v4508_v20, %v2819_v16  ;;  %v2837_v61 = vrot.slane %v4508_v20, 1  ;;  %v5116_v16 = vld [vmem:[#allocation45_spill] sm:$0xff] }
 0x18d   :  { %768 = vmatprep.mubr.f32.mxu0 %v5108_v47  ;;  %839 = vmatprep.mubr.f32.mxu1 %v5108_v47  ;;  %v2842_v33 = vsel %vm2841_vm1, %v2840_v23, %v2822_v28  ;;  %v5117_v28 = vld [vmem:[#allocation46_spill] sm:$0xff] }
 0x18e   :  { %v2844_v30 = vsel %vm2843_vm2, %v2842_v33, %v2825_v54  ;;  %v5118_v54 = vld [vmem:[#allocation47_spill] sm:$0xff]  ;;  %v560_v23 = vld [vmem:[%s559_s6] sm:$0x1]  ;;  %v5119_v33 = vld [vmem:[#allocation21_spill] sm:$0xff] }
 0x18f   :  { %3139 = vmatpush1.bf16.msra.mxu0 %v4380_v41  ;;  %3171 = vmatpush1.bf16.msra.mxu1 %v4384_v42  ;;  %v2846_v50 = vsel %vm2845_vm3, %v2844_v30, %v2828_v6  ;;  %v561_v6 = vmax.f32 %v560_v23, 0.0  ;;  %v5121_v30 = vld [vmem:[#allocation23_spill] sm:$0xff]  ;;  %v5128_v23 = vld [vmem:[#allocation30_spill] sm:$0xff] }
 0x190   :  { %3141 = vmatprep.subr.bf16.mxu0 %v4386_v43  ;;  %3173 = vmatprep.subr.bf16.mxu1 %v4389_v49  ;;  %v2848_v10 = vsel %vm2847_vm4, %v2846_v50, %v2831_v11  ;;  %v5120_v11 = vld [vmem:[#allocation22_spill] sm:$0xff]  ;;  %v5123_v50 = vld [vmem:[#allocation25_spill] sm:$0xff] }
 0x191   :  { %v2850_v56 = vsel %vm2849_vm5, %v2848_v10, %v2834_v46  ;;  %v5122_v46 = vld [vmem:[#allocation24_spill] sm:$0xff]  ;;  %v5125_v10 = vld [vmem:[#allocation27_spill] sm:$0xff] }
 0x192   :  { %v2852_v45 = vsel %vm2851_vm6, %v2850_v56, %v2837_v61  ;;  %v5124_v61 = vld [vmem:[#allocation26_spill] sm:$0xff]  ;;  %v5126_v56 = vld [vmem:[#allocation28_spill] sm:$0xff] }
 0x193   :  { %3143 = vmatpush1.bf16.msra.mxu0 %v4394_v3  ;;  %3175 = vmatpush1.bf16.msra.mxu1 %v5109_v55  ;;  %2853 = vst [vmem:[#allocation12] sm:$0xff] %v2852_v45  ;;  %v5127_v45 = vld [vmem:[#allocation29_spill] sm:$0xff] }
 0x194   :  { %3145 = vmatprep.subr.bf16.mxu0 %v5110_v37  ;;  %3177 = vmatprep.subr.bf16.mxu1 %v5111_v29 }
 0x197   :  { %3147 = vmatpush1.bf16.msra.mxu0 %v5112_v36  ;;  %3179 = vmatpush1.bf16.msra.mxu1 %v5113_v38 }
 0x198   :  { %3149 = vmatprep.subr.bf16.mxu0 %v5114_v21  ;;  %3181 = vmatprep.subr.bf16.mxu1 %v5115_v7 }
 0x19b   :  { %3151 = vmatpush1.bf16.msra.mxu0 %v5116_v16  ;;  %3183 = vmatpush1.bf16.msra.mxu1 %v4422_v19 }
 0x19c   :  { %3153 = vmatprep.subr.bf16.mxu0 %v5117_v28  ;;  %3185 = vmatprep.subr.bf16.mxu1 %v5118_v54 }
 0x19f   :  { %3155 = vmatpush1.bf16.msra.mxu0 %v4432_v58  ;;  %3187 = vmatpush1.bf16.msra.mxu1 %v4436_v0 }
 0x1a0   :  { %3157 = vmatprep.subr.bf16.mxu0 %v4438_v60  ;;  %3189 = vmatprep.subr.bf16.mxu1 %v4441_v59 }
 0x1a3   :  { %3159 = vmatpush1.bf16.msra.mxu0 %v4444_v24  ;;  %3191 = vmatpush1.bf16.msra.mxu1 %v4448_v34 }
 0x1a4   :  { %3161 = vmatprep.subr.bf16.mxu0 %v4450_v32  ;;  %3193 = vmatprep.subr.bf16.mxu1 %v4453_v48 }
 0x1a7   :  { %3163 = vmatpush1.bf16.msra.mxu0 %v4456_v62  ;;  %3195 = vmatpush1.bf16.msra.mxu1 %v4461_v5 }
 0x1a8   :  { %3197 = vmatprep.subr.bf16.mxu0 %v4266_v4  ;;  %3229 = vmatprep.subr.bf16.mxu1 %v4268_v8 }
 0x1aa   :  { %769 = vmatmul.mubr.f32.vlgmr.msra.gmra.mrb[4].mxu0 %v561_v6  ;;  %840 = vmatmul.mubr.f32.vlgmr.msra.gmra.mrb[4].mxu1 %v561_v6  ;;  %v5129_v6 = vld [vmem:[#allocation31_spill] sm:$0xff] }
 0x1ab   :  { %3199 = vmatpush1.bf16.msra.mxu0 %v4270_v9  ;;  %3231 = vmatpush1.bf16.msra.mxu1 %v4273_v13 }
 0x1ac   :  { %3201 = vmatprep.subr.bf16.mxu0 %v4277_v17  ;;  %3233 = vmatprep.subr.bf16.mxu1 %v4279_v18 }
 0x1ad   :  { %949 = vmatprep.mubr.f32.mxu0 %v5108_v47  ;;  %1020 = vmatprep.mubr.f32.mxu1 %v5108_v47 }
 0x1af   :  { %3203 = vmatpush1.bf16.msra.mxu0 %v4282_v22  ;;  %3235 = vmatpush1.bf16.msra.mxu1 %v4286_v26 }
 0x1b0   :  { %3205 = vmatprep.subr.bf16.mxu0 %v4288_v27  ;;  %3237 = vmatprep.subr.bf16.mxu1 %v4290_v31 }
 0x1b3   :  { %3207 = vmatpush1.bf16.msra.mxu0 %v4293_v35  ;;  %3239 = vmatpush1.bf16.msra.mxu1 %v4297_v39 }
 0x1b4   :  { %3209 = vmatprep.subr.bf16.mxu0 %v4299_v40  ;;  %3241 = vmatprep.subr.bf16.mxu1 %v4302_v44 }
 0x1b7   :  { %3211 = vmatpush1.bf16.msra.mxu0 %v4305_v51  ;;  %3243 = vmatpush1.bf16.msra.mxu1 %v4309_v52 }
 0x1b8   :  { %3213 = vmatprep.subr.bf16.mxu0 %v4311_v53  ;;  %3245 = vmatprep.subr.bf16.mxu1 %v4314_v57 }
 0x1bb   :  { %3215 = vmatpush1.bf16.msra.mxu0 %v4317_v63  ;;  %3247 = vmatpush1.bf16.msra.mxu1 %v4321_v1 }
 0x1bc   :  { %3217 = vmatprep.subr.bf16.mxu0 %v4323_v2  ;;  %3249 = vmatprep.subr.bf16.mxu1 %v5119_v33  ;;  %v5130_v33 = vld [vmem:[#allocation32_spill] sm:$0xff] }
 0x1bf   :  { %3219 = vmatpush1.bf16.msra.mxu0 %v5120_v11  ;;  %3251 = vmatpush1.bf16.msra.mxu1 %v5121_v30  ;;  %v5131_v11 = vld [vmem:[#allocation33_spill] sm:$0xff] }
 0x1c0   :  { %3221 = vmatprep.subr.bf16.mxu0 %v5122_v46  ;;  %3253 = vmatprep.subr.bf16.mxu1 %v5123_v50 }
 0x1c3   :  { %3223 = vmatpush1.bf16.msra.mxu0 %v5124_v61  ;;  %3255 = vmatpush1.bf16.msra.mxu1 %v5125_v10 }
 0x1c4   :  { %3225 = vmatprep.subr.bf16.mxu0 %v5126_v56  ;;  %3257 = vmatprep.subr.bf16.mxu1 %v5127_v45 }
 0x1c7   :  { %3227 = vmatpush1.bf16.msra.mxu0 %v5128_v23  ;;  %3259 = vmatpush1.bf16.msra.mxu1 %v5129_v6 }
 0x1c8   :  { %3261 = vmatprep.subr.bf16.mxu0 %v5130_v33  ;;  %3293 = vmatprep.subr.bf16.mxu1 %v5131_v11 }
 0x1ca   :  { %950 = vmatmul.mubr.f32.vlgmr.msra.gmra.mrb[6].mxu0 %v4508_v20  ;;  %1021 = vmatmul.mubr.f32.vlgmr.msra.gmra.mrb[6].mxu1 %v4508_v20 }
 0x1cb   :  { %3263 = vmatpush1.bf16.msra.mxu0 %v4368_v12  ;;  %3295 = vmatpush1.bf16.msra.mxu1 %v4372_v14 }
 0x1cc   :  { %3265 = vmatprep.subr.bf16.mxu0 %v4374_v15  ;;  %3297 = vmatprep.subr.bf16.mxu1 %v4377_v25 }
 0x1cd   :  { %1091 = vmatprep.mubr.f32.mxu0 %v5108_v47  ;;  %1162 = vmatprep.mubr.f32.mxu1 %v5108_v47 }
 0x1cf   :  { %3267 = vmatpush1.bf16.msra.mxu0 %v4380_v41  ;;  %3299 = vmatpush1.bf16.msra.mxu1 %v4384_v42 }
 0x1d0   :  { %3269 = vmatprep.subr.bf16.mxu0 %v4386_v43  ;;  %3301 = vmatprep.subr.bf16.mxu1 %v4389_v49 }
 0x1d3   :  { %3271 = vmatpush1.bf16.msra.mxu0 %v4394_v3  ;;  %3303 = vmatpush1.bf16.msra.mxu1 %v5109_v55 }
 0x1d4   :  { %3273 = vmatprep.subr.bf16.mxu0 %v5110_v37  ;;  %3305 = vmatprep.subr.bf16.mxu1 %v5111_v29 }
 0x1d7   :  { %3275 = vmatpush1.bf16.msra.mxu0 %v5112_v36  ;;  %3307 = vmatpush1.bf16.msra.mxu1 %v5113_v38 }
 0x1d8   :  { %3277 = vmatprep.subr.bf16.mxu0 %v5114_v21  ;;  %3309 = vmatprep.subr.bf16.mxu1 %v5115_v7 }
 0x1db   :  { %3279 = vmatpush1.bf16.msra.mxu0 %v5116_v16  ;;  %3311 = vmatpush1.bf16.msra.mxu1 %v4422_v19  ;;  %v883_v16 = vld [vmem:[%s882_s21] sm:$0x1] }
 0x1dc   :  { %3281 = vmatprep.subr.bf16.mxu0 %v5117_v28  ;;  %3313 = vmatprep.subr.bf16.mxu1 %v5118_v54  ;;  %v884_v28 = vmax.f32 %v883_v16, 0.0  ;;  %v5132_v16 = vld [vmem:[#allocation21_spill] sm:$0xff] }
 0x1df   :  { %3283 = vmatpush1.bf16.msra.mxu0 %v4432_v58  ;;  %3315 = vmatpush1.bf16.msra.mxu1 %v4436_v0 }
 0x1e0   :  { %3285 = vmatprep.subr.bf16.mxu0 %v4438_v60  ;;  %3317 = vmatprep.subr.bf16.mxu1 %v4441_v59 }
 0x1e3   :  { %3287 = vmatpush1.bf16.msra.mxu0 %v4444_v24  ;;  %3319 = vmatpush1.bf16.msra.mxu1 %v4448_v34 }
 0x1e4   :  { %3289 = vmatprep.subr.bf16.mxu0 %v4450_v32  ;;  %3321 = vmatprep.subr.bf16.mxu1 %v4453_v48 }
 0x1e7   :  { %3291 = vmatpush1.bf16.msra.mxu0 %v4456_v62  ;;  %3323 = vmatpush1.bf16.msra.mxu1 %v4461_v5 }
 0x1e8   :  { %3325 = vmatprep.subr.bf16.mxu0 %v4266_v4  ;;  %3357 = vmatprep.subr.bf16.mxu1 %v4268_v8 }
 0x1ea   :  { %1092 = vmatmul.mubr.f32.vlgmr.msra.gmra.mrb[8].mxu0 %v884_v28  ;;  %1163 = vmatmul.mubr.f32.vlgmr.msra.gmra.mrb[8].mxu1 %v884_v28  ;;  %v5133_v28 = vld [vmem:[#allocation22_spill] sm:$0xff] }
 0x1eb   :  { %3327 = vmatpush1.bf16.msra.mxu0 %v4270_v9  ;;  %3359 = vmatpush1.bf16.msra.mxu1 %v4273_v13 }
 0x1ec   :  { %3329 = vmatprep.subr.bf16.mxu0 %v4277_v17  ;;  %3361 = vmatprep.subr.bf16.mxu1 %v4279_v18 }
 0x1ed   :  { %1272 = vmatprep.mubr.f32.mxu0 %v5108_v47  ;;  %1343 = vmatprep.mubr.f32.mxu1 %v5108_v47 }
 0x1ef   :  { %3331 = vmatpush1.bf16.msra.mxu0 %v4282_v22  ;;  %3363 = vmatpush1.bf16.msra.mxu1 %v4286_v26 }
 0x1f0   :  { %3333 = vmatprep.subr.bf16.mxu0 %v4288_v27  ;;  %3365 = vmatprep.subr.bf16.mxu1 %v4290_v31 }
 0x1f3   :  { %3335 = vmatpush1.bf16.msra.mxu0 %v4293_v35  ;;  %3367 = vmatpush1.bf16.msra.mxu1 %v4297_v39 }
 0x1f4   :  { %3337 = vmatprep.subr.bf16.mxu0 %v4299_v40  ;;  %3369 = vmatprep.subr.bf16.mxu1 %v4302_v44 }
 0x1f7   :  { %3339 = vmatpush1.bf16.msra.mxu0 %v4305_v51  ;;  %3371 = vmatpush1.bf16.msra.mxu1 %v4309_v52 }
 0x1f8   :  { %3341 = vmatprep.subr.bf16.mxu0 %v4311_v53  ;;  %3373 = vmatprep.subr.bf16.mxu1 %v4314_v57 }
 0x1fb   :  { %3343 = vmatpush1.bf16.msra.mxu0 %v4317_v63  ;;  %3375 = vmatpush1.bf16.msra.mxu1 %v4321_v1 }
 0x1fc   :  { %3345 = vmatprep.subr.bf16.mxu0 %v4323_v2  ;;  %3377 = vmatprep.subr.bf16.mxu1 %v5132_v16 }
 0x1ff   :  { %3347 = vmatpush1.bf16.msra.mxu0 %v5133_v28  ;;  %3379 = vmatpush1.bf16.msra.mxu1 %v5121_v30 }
 0x200   :  { %3349 = vmatprep.subr.bf16.mxu0 %v5122_v46  ;;  %3381 = vmatprep.subr.bf16.mxu1 %v5123_v50 }
 0x203   :  { %3351 = vmatpush1.bf16.msra.mxu0 %v5124_v61  ;;  %3383 = vmatpush1.bf16.msra.mxu1 %v5125_v10 }
 0x204   :  { %3353 = vmatprep.subr.bf16.mxu0 %v5126_v56  ;;  %3385 = vmatprep.subr.bf16.mxu1 %v5127_v45 }
 0x207   :  { %3355 = vmatpush1.bf16.msra.mxu0 %v5128_v23  ;;  %3387 = vmatpush1.bf16.msra.mxu1 %v5129_v6 }
 0x208   :  { %3389 = vmatprep.subr.bf16.mxu0 %v5130_v33  ;;  %3421 = vmatprep.subr.bf16.mxu1 %v5131_v11 }
 0x20a   :  { %1273 = vmatmul.mubr.f32.vlgmr.msra.gmra.mrb[10].mxu0 %v4508_v20  ;;  %1344 = vmatmul.mubr.f32.vlgmr.msra.gmra.mrb[10].mxu1 %v4508_v20 }
 0x20b   :  { %3391 = vmatpush1.bf16.msra.mxu0 %v4368_v12  ;;  %3423 = vmatpush1.bf16.msra.mxu1 %v4372_v14 }
 0x20c   :  { %3393 = vmatprep.subr.bf16.mxu0 %v4374_v15  ;;  %3425 = vmatprep.subr.bf16.mxu1 %v4377_v25 }
 0x20d   :  { %1414 = vmatprep.mubr.f32.mxu0 %v5108_v47  ;;  %1485 = vmatprep.mubr.f32.mxu1 %v5108_v47 }
 0x20f   :  { %3395 = vmatpush1.bf16.msra.mxu0 %v4380_v41  ;;  %3427 = vmatpush1.bf16.msra.mxu1 %v4384_v42 }
 0x210   :  { %3397 = vmatprep.subr.bf16.mxu0 %v4386_v43  ;;  %3429 = vmatprep.subr.bf16.mxu1 %v4389_v49  ;;  %v5134_v43 = vld [vmem:[#allocation45_spill] sm:$0xff] }
 0x213   :  { %3399 = vmatpush1.bf16.msra.mxu0 %v4394_v3  ;;  %3431 = vmatpush1.bf16.msra.mxu1 %v5109_v55  ;;  %v5135_v3 = vld [vmem:[#allocation46_spill] sm:$0xff] }
 0x214   :  { %3401 = vmatprep.subr.bf16.mxu0 %v5110_v37  ;;  %3433 = vmatprep.subr.bf16.mxu1 %v5111_v29 }
 0x217   :  { %3403 = vmatpush1.bf16.msra.mxu0 %v5112_v36  ;;  %3435 = vmatpush1.bf16.msra.mxu1 %v5113_v38 }
 0x218   :  { %3405 = vmatprep.subr.bf16.mxu0 %v5114_v21  ;;  %3437 = vmatprep.subr.bf16.mxu1 %v5115_v7 }
 0x21b   :  { %3407 = vmatpush1.bf16.msra.mxu0 %v5134_v43  ;;  %3439 = vmatpush1.bf16.msra.mxu1 %v4422_v19  ;;  %v1206_v43 = vld [vmem:[%s1205_s20] sm:$0x1] }
 0x21c   :  { %3409 = vmatprep.subr.bf16.mxu0 %v5135_v3  ;;  %3441 = vmatprep.subr.bf16.mxu1 %v5118_v54  ;;  %v1207_v3 = vmax.f32 %v1206_v43, 0.0  ;;  %v5136_v43 = vld [vmem:[#allocation35_spill] sm:$0xff] }
 0x21f   :  { %3411 = vmatpush1.bf16.msra.mxu0 %v4432_v58  ;;  %3443 = vmatpush1.bf16.msra.mxu1 %v4436_v0 }
 0x220   :  { %3413 = vmatprep.subr.bf16.mxu0 %v4438_v60  ;;  %3445 = vmatprep.subr.bf16.mxu1 %v4441_v59 }
 0x223   :  { %3415 = vmatpush1.bf16.msra.mxu0 %v4444_v24  ;;  %3447 = vmatpush1.bf16.msra.mxu1 %v4448_v34 }
 0x224   :  { %3417 = vmatprep.subr.bf16.mxu0 %v4450_v32  ;;  %3449 = vmatprep.subr.bf16.mxu1 %v4453_v48 }
 0x227   :  { %3419 = vmatpush1.bf16.msra.mxu0 %v4456_v62  ;;  %3451 = vmatpush1.bf16.msra.mxu1 %v4461_v5 }
 0x228   :  { %3453 = vmatprep.subr.bf16.mxu0 %v4266_v4  ;;  %3485 = vmatprep.subr.bf16.mxu1 %v4268_v8 }
 0x22a   :  { %1415 = vmatmul.mubr.f32.vlgmr.msra.gmra.mrb[12].mxu0 %v1207_v3  ;;  %1486 = vmatmul.mubr.f32.vlgmr.msra.gmra.mrb[12].mxu1 %v1207_v3  ;;  %v5137_v3 = vld [vmem:[#allocation37_spill] sm:$0xff] }
 0x22b   :  { %3455 = vmatpush1.bf16.msra.mxu0 %v4270_v9  ;;  %3487 = vmatpush1.bf16.msra.mxu1 %v4273_v13 }
 0x22c   :  { %3457 = vmatprep.subr.bf16.mxu0 %v4277_v17  ;;  %3489 = vmatprep.subr.bf16.mxu1 %v4279_v18 }
 0x22d   :  { %1595 = vmatprep.mubr.f32.mxu0 %v5108_v47  ;;  %1666 = vmatprep.mubr.f32.mxu1 %v5108_v47 }
 0x22f   :  { %3459 = vmatpush1.bf16.msra.mxu0 %v4282_v22  ;;  %3491 = vmatpush1.bf16.msra.mxu1 %v4286_v26 }
 0x230   :  { %3461 = vmatprep.subr.bf16.mxu0 %v4288_v27  ;;  %3493 = vmatprep.subr.bf16.mxu1 %v4290_v31 }
 0x233   :  { %3463 = vmatpush1.bf16.msra.mxu0 %v4293_v35  ;;  %3495 = vmatpush1.bf16.msra.mxu1 %v4297_v39 }
 0x234   :  { %3465 = vmatprep.subr.bf16.mxu0 %v4299_v40  ;;  %3497 = vmatprep.subr.bf16.mxu1 %v4302_v44 }
 0x237   :  { %3467 = vmatpush1.bf16.msra.mxu0 %v4305_v51  ;;  %3499 = vmatpush1.bf16.msra.mxu1 %v4309_v52 }
 0x238   :  { %3469 = vmatprep.subr.bf16.mxu0 %v4311_v53  ;;  %3501 = vmatprep.subr.bf16.mxu1 %v4314_v57 }
 0x23b   :  { %3471 = vmatpush1.bf16.msra.mxu0 %v4317_v63  ;;  %3503 = vmatpush1.bf16.msra.mxu1 %v4321_v1 }
 0x23c   :  { %3473 = vmatprep.subr.bf16.mxu0 %v4323_v2  ;;  %3505 = vmatprep.subr.bf16.mxu1 %v5132_v16 }
 0x23f   :  { %3475 = vmatpush1.bf16.msra.mxu0 %v5133_v28  ;;  %3507 = vmatpush1.bf16.msra.mxu1 %v5121_v30 }
 0x240   :  { %3477 = vmatprep.subr.bf16.mxu0 %v5122_v46  ;;  %3509 = vmatprep.subr.bf16.mxu1 %v5123_v50 }
 0x243   :  { %3479 = vmatpush1.bf16.msra.mxu0 %v5124_v61  ;;  %3511 = vmatpush1.bf16.msra.mxu1 %v5125_v10 }
 0x244   :  { %3481 = vmatprep.subr.bf16.mxu0 %v5126_v56  ;;  %3513 = vmatprep.subr.bf16.mxu1 %v5127_v45 }
 0x247   :  { %3483 = vmatpush1.bf16.msra.mxu0 %v5128_v23  ;;  %3515 = vmatpush1.bf16.msra.mxu1 %v5129_v6 }
 0x248   :  { %3517 = vmatprep.subr.bf16.mxu0 %v5130_v33  ;;  %3549 = vmatprep.subr.bf16.mxu1 %v5131_v11 }
 0x24a   :  { %1596 = vmatmul.mubr.f32.vlgmr.msra.gmra.mrb[14].mxu0 %v4508_v20  ;;  %1667 = vmatmul.mubr.f32.vlgmr.msra.gmra.mrb[14].mxu1 %v4508_v20 }
 0x24b   :  { %3519 = vmatpush1.bf16.msra.mxu0 %v4368_v12  ;;  %3551 = vmatpush1.bf16.msra.mxu1 %v4372_v14 }
 0x24c   :  { %3521 = vmatprep.subr.bf16.mxu0 %v4374_v15  ;;  %3553 = vmatprep.subr.bf16.mxu1 %v4377_v25 }
 0x24d   :  { %1737 = vmatprep.mubr.f32.mxu0 %v5108_v47  ;;  %1808 = vmatprep.mubr.f32.mxu1 %v5108_v47 }
 0x24f   :  { %3523 = vmatpush1.bf16.msra.mxu0 %v4380_v41  ;;  %3555 = vmatpush1.bf16.msra.mxu1 %v4384_v42 }
 0x250   :  { %3525 = vmatprep.subr.bf16.mxu0 %v5136_v43  ;;  %3557 = vmatprep.subr.bf16.mxu1 %v4389_v49  ;;  %v5138_v43 = vld [vmem:[#allocation45_spill] sm:$0xff] }
 0x253   :  { %3527 = vmatpush1.bf16.msra.mxu0 %v5137_v3  ;;  %3559 = vmatpush1.bf16.msra.mxu1 %v5109_v55  ;;  %v5139_v3 = vld [vmem:[#allocation46_spill] sm:$0xff] }
 0x254   :  { %3529 = vmatprep.subr.bf16.mxu0 %v5110_v37  ;;  %3561 = vmatprep.subr.bf16.mxu1 %v5111_v29 }
 0x257   :  { %3531 = vmatpush1.bf16.msra.mxu0 %v5112_v36  ;;  %3563 = vmatpush1.bf16.msra.mxu1 %v5113_v38 }
 0x258   :  { %3533 = vmatprep.subr.bf16.mxu0 %v5114_v21  ;;  %3565 = vmatprep.subr.bf16.mxu1 %v5115_v7 }
 0x25b   :  { %3535 = vmatpush1.bf16.msra.mxu0 %v5138_v43  ;;  %3567 = vmatpush1.bf16.msra.mxu1 %v4422_v19 }
 0x25c   :  { %3537 = vmatprep.subr.bf16.mxu0 %v5139_v3  ;;  %3569 = vmatprep.subr.bf16.mxu1 %v5118_v54  ;;  %v1529_v3 = vld [vmem:[%s1528_s23] sm:$0x1] }
 0x25d   :  { %v628_v37 = vpop.f32.mrb[2].mxu0  ;;  %v699_v55 = vpop.f32.mrb[2].mxu1 }
 0x25e   :  { %v630_v29 = vpop.f32.mrb[3].mxu0  ;;  %v701_v49 = vpop.f32.mrb[3].mxu1  ;;  %v1530_v55 = vmax.f32 %v1529_v3, 0.0 }
 0x25f   :  { %3539 = vmatpush1.bf16.msra.mxu0 %v4432_v58  ;;  %3571 = vmatpush1.bf16.msra.mxu1 %v4436_v0 }
 0x260   :  { %3541 = vmatprep.subr.bf16.mxu0 %v4438_v60  ;;  %3573 = vmatprep.subr.bf16.mxu1 %v4441_v59 }
 0x263   :  { %3543 = vmatpush1.bf16.msra.mxu0 %v4444_v24  ;;  %3575 = vmatpush1.bf16.msra.mxu1 %v4448_v34 }
 0x264   :  { %3545 = vmatprep.subr.bf16.mxu0 %v4450_v32  ;;  %3577 = vmatprep.subr.bf16.mxu1 %v4453_v48 }
 0x267   :  { %3547 = vmatpush1.bf16.msra.mxu0 %v4456_v62  ;;  %3579 = vmatpush1.bf16.msra.mxu1 %v4461_v5 }
 0x268   :  { %3581 = vmatprep.subr.bf16.mxu0 %v4266_v4  ;;  %3613 = vmatprep.subr.bf16.mxu1 %v4268_v8 }
 0x26a   :  { %1738 = vmatmul.mubr.f32.vlgmr.msra.gmra.mrb[16].mxu0 %v1530_v55  ;;  %1809 = vmatmul.mubr.f32.vlgmr.msra.gmra.mrb[16].mxu1 %v1530_v55  ;;  %v5140_v55 = vld [vmem:[#allocation35_spill] sm:$0xff] }
 0x26b   :  { %3583 = vmatpush1.bf16.msra.mxu0 %v4270_v9  ;;  %3615 = vmatpush1.bf16.msra.mxu1 %v4273_v13 }
 0x26c   :  { %3585 = vmatprep.subr.bf16.mxu0 %v4277_v17  ;;  %3617 = vmatprep.subr.bf16.mxu1 %v4279_v18 }
 0x26d   :  { %1918 = vmatprep.mubr.f32.mxu0 %v5108_v47  ;;  %1989 = vmatprep.mubr.f32.mxu1 %v5108_v47 }
 0x26f   :  { %3587 = vmatpush1.bf16.msra.mxu0 %v4282_v22  ;;  %3619 = vmatpush1.bf16.msra.mxu1 %v4286_v26 }
 0x270   :  { %3589 = vmatprep.subr.bf16.mxu0 %v4288_v27  ;;  %3621 = vmatprep.subr.bf16.mxu1 %v4290_v31 }
 0x273   :  { %3591 = vmatpush1.bf16.msra.mxu0 %v4293_v35  ;;  %3623 = vmatpush1.bf16.msra.mxu1 %v4297_v39 }
 0x274   :  { %3593 = vmatprep.subr.bf16.mxu0 %v4299_v40  ;;  %3625 = vmatprep.subr.bf16.mxu1 %v4302_v44 }
 0x277   :  { %3595 = vmatpush1.bf16.msra.mxu0 %v4305_v51  ;;  %3627 = vmatpush1.bf16.msra.mxu1 %v4309_v52 }
 0x278   :  { %3597 = vmatprep.subr.bf16.mxu0 %v4311_v53  ;;  %3629 = vmatprep.subr.bf16.mxu1 %v4314_v57 }
 0x27b   :  { %3599 = vmatpush1.bf16.msra.mxu0 %v4317_v63  ;;  %3631 = vmatpush1.bf16.msra.mxu1 %v4321_v1 }
 0x27c   :  { %3601 = vmatprep.subr.bf16.mxu0 %v4323_v2  ;;  %3633 = vmatprep.subr.bf16.mxu1 %v5132_v16 }
 0x27d   :  { %v770_v49 = vpop.f32.mrb[4].mxu0  ;;  %v841_v37 = vpop.f32.mrb[4].mxu1 }
 0x27e   :  { %v772_v29 = vpop.f32.mrb[5].mxu0  ;;  %v843_v3 = vpop.f32.mrb[5].mxu1  ;;  %v5141_v49 = vld [vmem:[#allocation36_spill] sm:$0xff]  ;;  %v5142_v37 = vld [vmem:[#allocation37_spill] sm:$0xff] }
 0x27f   :  { %3603 = vmatpush1.bf16.msra.mxu0 %v5133_v28  ;;  %3635 = vmatpush1.bf16.msra.mxu1 %v5121_v30  ;;  %v5143_v29 = vld [vmem:[#allocation38_spill] sm:$0xff]  ;;  %v5144_v3 = vld [vmem:[#allocation39_spill] sm:$0xff] }
 0x280   :  { %3605 = vmatprep.subr.bf16.mxu0 %v5122_v46  ;;  %3637 = vmatprep.subr.bf16.mxu1 %v5123_v50 }
 0x283   :  { %3607 = vmatpush1.bf16.msra.mxu0 %v5124_v61  ;;  %3639 = vmatpush1.bf16.msra.mxu1 %v5125_v10 }
 0x284   :  { %3609 = vmatprep.subr.bf16.mxu0 %v5126_v56  ;;  %3641 = vmatprep.subr.bf16.mxu1 %v5127_v45 }
 0x287   :  { %3611 = vmatpush1.bf16.msra.mxu0 %v5128_v23  ;;  %3643 = vmatpush1.bf16.msra.mxu1 %v5129_v6 }
 0x288   :  { %3645 = vmatprep.subr.bf16.mxu0 %v5130_v33  ;;  %3677 = vmatprep.subr.bf16.mxu1 %v5131_v11 }
 0x28a   :  { %1919 = vmatmul.mubr.f32.vlgmr.msra.gmra.mrb[18].mxu0 %v4508_v20  ;;  %1990 = vmatmul.mubr.f32.vlgmr.msra.gmra.mrb[18].mxu1 %v4508_v20 }
 0x28b   :  { %3647 = vmatpush1.bf16.msra.mxu0 %v4368_v12  ;;  %3679 = vmatpush1.bf16.msra.mxu1 %v4372_v14 }
 0x28c   :  { %3649 = vmatprep.subr.bf16.mxu0 %v4374_v15  ;;  %3681 = vmatprep.subr.bf16.mxu1 %v4377_v25  ;;  %v5145_v15 = vld [vmem:[#allocation40_spill] sm:$0xff] }
 0x28d   :  { %2060 = vmatprep.mubr.f32.mxu0 %v5108_v47  ;;  %2131 = vmatprep.mubr.f32.mxu1 %v5108_v47 }
 0x28f   :  { %3651 = vmatpush1.bf16.msra.mxu0 %v4380_v41  ;;  %3683 = vmatpush1.bf16.msra.mxu1 %v4384_v42 }
 0x290   :  { %3653 = vmatprep.subr.bf16.mxu0 %v5140_v55  ;;  %3685 = vmatprep.subr.bf16.mxu1 %v5141_v49 }
 0x293   :  { %3655 = vmatpush1.bf16.msra.mxu0 %v5142_v37  ;;  %3687 = vmatpush1.bf16.msra.mxu1 %v5143_v29  ;;  %v5146_v37 = vld [vmem:[#allocation46_spill] sm:$0xff] }
 0x294   :  { %3657 = vmatprep.subr.bf16.mxu0 %v5144_v3  ;;  %3689 = vmatprep.subr.bf16.mxu1 %v5145_v15 }
 0x297   :  { %3659 = vmatpush1.bf16.msra.mxu0 %v5112_v36  ;;  %3691 = vmatpush1.bf16.msra.mxu1 %v5113_v38 }
 0x298   :  { %3661 = vmatprep.subr.bf16.mxu0 %v5114_v21  ;;  %3693 = vmatprep.subr.bf16.mxu1 %v5115_v7 }
 0x29b   :  { %3663 = vmatpush1.bf16.msra.mxu0 %v5138_v43  ;;  %3695 = vmatpush1.bf16.msra.mxu1 %v4422_v19 }
 0x29c   :  { %3665 = vmatprep.subr.bf16.mxu0 %v5146_v37  ;;  %3697 = vmatprep.subr.bf16.mxu1 %v5118_v54  ;;  %v1852_v37 = vld [vmem:[%s1851_s25] sm:$0x1] }
 0x29d   :  { %v951_v3 = vpop.f32.mrb[6].mxu0  ;;  %v1022_v29 = vpop.f32.mrb[6].mxu1 }
 0x29e   :  { %v953_v15 = vpop.f32.mrb[7].mxu0  ;;  %v1024_v49 = vpop.f32.mrb[7].mxu1 }
 0x29f   :  { %3667 = vmatpush1.bf16.msra.mxu0 %v4432_v58  ;;  %3699 = vmatpush1.bf16.msra.mxu1 %v4436_v0  ;;  %v1853_v15 = vmax.f32 %v1852_v37, 0.0 }
 0x2a0   :  { %3669 = vmatprep.subr.bf16.mxu0 %v4438_v60  ;;  %3701 = vmatprep.subr.bf16.mxu1 %v4441_v59 }
 0x2a3   :  { %3671 = vmatpush1.bf16.msra.mxu0 %v4444_v24  ;;  %3703 = vmatpush1.bf16.msra.mxu1 %v4448_v34 }
 0x2a4   :  { %3673 = vmatprep.subr.bf16.mxu0 %v4450_v32  ;;  %3705 = vmatprep.subr.bf16.mxu1 %v4453_v48 }
 0x2a7   :  { %3675 = vmatpush1.bf16.msra.mxu0 %v4456_v62  ;;  %3707 = vmatpush1.bf16.msra.mxu1 %v4461_v5 }
 0x2a8   :  { %3709 = vmatprep.subr.bf16.mxu0 %v4266_v4  ;;  %3741 = vmatprep.subr.bf16.mxu1 %v4268_v8 }
 0x2aa   :  { %2061 = vmatmul.mubr.f32.vlgmr.msra.gmra.mrb[20].mxu0 %v1853_v15  ;;  %2132 = vmatmul.mubr.f32.vlgmr.msra.gmra.mrb[20].mxu1 %v1853_v15  ;;  %v5147_v15 = vld [vmem:[#allocation34_spill] sm:$0xff] }
 0x2ab   :  { %3711 = vmatpush1.bf16.msra.mxu0 %v4270_v9  ;;  %3743 = vmatpush1.bf16.msra.mxu1 %v4273_v13 }
 0x2ac   :  { %3713 = vmatprep.subr.bf16.mxu0 %v4277_v17  ;;  %3745 = vmatprep.subr.bf16.mxu1 %v4279_v18 }
 0x2ad   :  { %2241 = vmatprep.mubr.f32.mxu0 %v5108_v47  ;;  %2312 = vmatprep.mubr.f32.mxu1 %v5108_v47 }
 0x2af   :  { %3715 = vmatpush1.bf16.msra.mxu0 %v4282_v22  ;;  %3747 = vmatpush1.bf16.msra.mxu1 %v4286_v26 }
 0x2b0   :  { %3717 = vmatprep.subr.bf16.mxu0 %v4288_v27  ;;  %3749 = vmatprep.subr.bf16.mxu1 %v4290_v31 }
 0x2b3   :  { %3719 = vmatpush1.bf16.msra.mxu0 %v4293_v35  ;;  %3751 = vmatpush1.bf16.msra.mxu1 %v4297_v39 }
 0x2b4   :  { %3721 = vmatprep.subr.bf16.mxu0 %v4299_v40  ;;  %3753 = vmatprep.subr.bf16.mxu1 %v4302_v44 }
 0x2b7   :  { %3723 = vmatpush1.bf16.msra.mxu0 %v4305_v51  ;;  %3755 = vmatpush1.bf16.msra.mxu1 %v4309_v52 }
 0x2b8   :  { %3725 = vmatprep.subr.bf16.mxu0 %v4311_v53  ;;  %3757 = vmatprep.subr.bf16.mxu1 %v4314_v57 }
 0x2bb   :  { %3727 = vmatpush1.bf16.msra.mxu0 %v4317_v63  ;;  %3759 = vmatpush1.bf16.msra.mxu1 %v4321_v1 }
 0x2bc   :  { %3729 = vmatprep.subr.bf16.mxu0 %v4323_v2  ;;  %3761 = vmatprep.subr.bf16.mxu1 %v5132_v16 }
 0x2bd   :  { %v1093_v49 = vpop.f32.mrb[8].mxu0  ;;  %v1164_v37 = vpop.f32.mrb[8].mxu1 }
 0x2be   :  { %v1095_v29 = vpop.f32.mrb[9].mxu0  ;;  %v1166_v3 = vpop.f32.mrb[9].mxu1  ;;  %v5148_v49 = vld [vmem:[#allocation36_spill] sm:$0xff]  ;;  %v5149_v37 = vld [vmem:[#allocation37_spill] sm:$0xff] }
 0x2bf   :  { %3731 = vmatpush1.bf16.msra.mxu0 %v5133_v28  ;;  %3763 = vmatpush1.bf16.msra.mxu1 %v5121_v30  ;;  %v5150_v29 = vld [vmem:[#allocation38_spill] sm:$0xff]  ;;  %v5151_v3 = vld [vmem:[#allocation39_spill] sm:$0xff] }
 0x2c0   :  { %3733 = vmatprep.subr.bf16.mxu0 %v5122_v46  ;;  %3765 = vmatprep.subr.bf16.mxu1 %v5123_v50 }
 0x2c3   :  { %3735 = vmatpush1.bf16.msra.mxu0 %v5124_v61  ;;  %3767 = vmatpush1.bf16.msra.mxu1 %v5125_v10 }
 0x2c4   :  { %3737 = vmatprep.subr.bf16.mxu0 %v5126_v56  ;;  %3769 = vmatprep.subr.bf16.mxu1 %v5127_v45 }
 0x2c7   :  { %3739 = vmatpush1.bf16.msra.mxu0 %v5128_v23  ;;  %3771 = vmatpush1.bf16.msra.mxu1 %v5129_v6 }
 0x2c8   :  { %3773 = vmatprep.subr.bf16.mxu0 %v5130_v33  ;;  %3805 = vmatprep.subr.bf16.mxu1 %v5131_v11 }
 0x2ca   :  { %2242 = vmatmul.mubr.f32.vlgmr.msra.gmra.mrb[22].mxu0 %v4508_v20  ;;  %2313 = vmatmul.mubr.f32.vlgmr.msra.gmra.mrb[22].mxu1 %v4508_v20 }
 0x2cb   :  { %3775 = vmatpush1.bf16.msra.mxu0 %v4368_v12  ;;  %3807 = vmatpush1.bf16.msra.mxu1 %v4372_v14 }
 0x2cc   :  { %3777 = vmatprep.subr.bf16.mxu0 %v5147_v15  ;;  %3809 = vmatprep.subr.bf16.mxu1 %v4377_v25  ;;  %v5152_v15 = vld [vmem:[#allocation40_spill] sm:$0xff] }
 0x2cd   :  { %2383 = vmatprep.mubr.f32.mxu0 %v5108_v47  ;;  %2454 = vmatprep.mubr.f32.mxu1 %v5108_v47 }
 0x2cf   :  { %3779 = vmatpush1.bf16.msra.mxu0 %v4380_v41  ;;  %3811 = vmatpush1.bf16.msra.mxu1 %v4384_v42 }
 0x2d0   :  { %3781 = vmatprep.subr.bf16.mxu0 %v5140_v55  ;;  %3813 = vmatprep.subr.bf16.mxu1 %v5148_v49 }
 0x2d3   :  { %3783 = vmatpush1.bf16.msra.mxu0 %v5149_v37  ;;  %3815 = vmatpush1.bf16.msra.mxu1 %v5150_v29  ;;  %v5153_v37 = vld [vmem:[#allocation46_spill] sm:$0xff] }
 0x2d4   :  { %3785 = vmatprep.subr.bf16.mxu0 %v5151_v3  ;;  %3817 = vmatprep.subr.bf16.mxu1 %v5152_v15 }
 0x2d7   :  { %3787 = vmatpush1.bf16.msra.mxu0 %v5112_v36  ;;  %3819 = vmatpush1.bf16.msra.mxu1 %v5113_v38 }
 0x2d8   :  { %3789 = vmatprep.subr.bf16.mxu0 %v5114_v21  ;;  %3821 = vmatprep.subr.bf16.mxu1 %v5115_v7 }
 0x2db   :  { %3791 = vmatpush1.bf16.msra.mxu0 %v5138_v43  ;;  %3823 = vmatpush1.bf16.msra.mxu1 %v4422_v19 }
 0x2dc   :  { %3793 = vmatprep.subr.bf16.mxu0 %v5153_v37  ;;  %3825 = vmatprep.subr.bf16.mxu1 %v5118_v54  ;;  %v2175_v37 = vld [vmem:[%s2174_s0] sm:$0x1] }
 0x2dd   :  { %v1274_v3 = vpop.f32.mrb[10].mxu0  ;;  %v1345_v29 = vpop.f32.mrb[10].mxu1 }
 0x2de   :  { %v1276_v15 = vpop.f32.mrb[11].mxu0  ;;  %v1347_v49 = vpop.f32.mrb[11].mxu1 }
 0x2df   :  { %3795 = vmatpush1.bf16.msra.mxu0 %v4432_v58  ;;  %3827 = vmatpush1.bf16.msra.mxu1 %v4436_v0  ;;  %v2176_v15 = vmax.f32 %v2175_v37, 0.0 }
 0x2e0   :  { %3797 = vmatprep.subr.bf16.mxu0 %v4438_v60  ;;  %3829 = vmatprep.subr.bf16.mxu1 %v4441_v59 }
 0x2e3   :  { %3799 = vmatpush1.bf16.msra.mxu0 %v4444_v24  ;;  %3831 = vmatpush1.bf16.msra.mxu1 %v4448_v34 }
 0x2e4   :  { %3801 = vmatprep.subr.bf16.mxu0 %v4450_v32  ;;  %3833 = vmatprep.subr.bf16.mxu1 %v4453_v48 }
 0x2e7   :  { %3803 = vmatpush1.bf16.msra.mxu0 %v4456_v62  ;;  %3835 = vmatpush1.bf16.msra.mxu1 %v4461_v5 }
 0x2e8   :  { %3837 = vmatprep.subr.bf16.mxu0 %v4266_v4  ;;  %3869 = vmatprep.subr.bf16.mxu1 %v4268_v8 }
 0x2ea   :  { %2384 = vmatmul.mubr.f32.vlgmr.msra.gmra.mrb[24].mxu0 %v2176_v15  ;;  %2455 = vmatmul.mubr.f32.vlgmr.msra.gmra.mrb[24].mxu1 %v2176_v15 }
 0x2eb   :  { %3839 = vmatpush1.bf16.msra.mxu0 %v4270_v9  ;;  %3871 = vmatpush1.bf16.msra.mxu1 %v4273_v13 }
 0x2ec   :  { %3841 = vmatprep.subr.bf16.mxu0 %v4277_v17  ;;  %3873 = vmatprep.subr.bf16.mxu1 %v4279_v18  ;;  %v5154_v17 = vld [vmem:[#allocation34_spill] sm:$0xff]  ;;  %v5155_v18 = vld [vmem:[#allocation36_spill] sm:$0xff] }
 0x2ed   :  { %2564 = vmatprep.mubr.f32.mxu0 %v5108_v47  ;;  %2635 = vmatprep.mubr.f32.mxu1 %v5108_v47 }
 0x2ef   :  { %3843 = vmatpush1.bf16.msra.mxu0 %v4282_v22  ;;  %3875 = vmatpush1.bf16.msra.mxu1 %v4286_v26  ;;  %v5156_v22 = vld [vmem:[#allocation37_spill] sm:$0xff]  ;;  %v5157_v26 = vld [vmem:[#allocation38_spill] sm:$0xff] }
 0x2f0   :  { %3845 = vmatprep.subr.bf16.mxu0 %v4288_v27  ;;  %3877 = vmatprep.subr.bf16.mxu1 %v4290_v31  ;;  %v5158_v27 = vld [vmem:[#allocation39_spill] sm:$0xff]  ;;  %v5159_v31 = vld [vmem:[#allocation40_spill] sm:$0xff] }
 0x2f3   :  { %3847 = vmatpush1.bf16.msra.mxu0 %v4293_v35  ;;  %3879 = vmatpush1.bf16.msra.mxu1 %v4297_v39  ;;  %v5160_v35 = vld [vmem:[#allocation46_spill] sm:$0xff] }
 0x2f4   :  { %3849 = vmatprep.subr.bf16.mxu0 %v4299_v40  ;;  %3881 = vmatprep.subr.bf16.mxu1 %v4302_v44 }
 0x2f7   :  { %3851 = vmatpush1.bf16.msra.mxu0 %v4305_v51  ;;  %3883 = vmatpush1.bf16.msra.mxu1 %v4309_v52  ;;  %v2498_v52 = vld [vmem:[%s2497_s30] sm:$0x1] }
 0x2f8   :  { %3853 = vmatprep.subr.bf16.mxu0 %v4311_v53  ;;  %3885 = vmatprep.subr.bf16.mxu1 %v4314_v57  ;;  %v2499_v53 = vmax.f32 %v2498_v52, 0.0 }
 0x2fb   :  { %3855 = vmatpush1.bf16.msra.mxu0 %v4317_v63  ;;  %3887 = vmatpush1.bf16.msra.mxu1 %v4321_v1 }
 0x2fc   :  { %3857 = vmatprep.subr.bf16.mxu0 %v4323_v2  ;;  %3889 = vmatprep.subr.bf16.mxu1 %v5132_v16 }
 0x2fd   :  { %v1416_v4 = vpop.f32.mrb[12].mxu0  ;;  %v1487_v8 = vpop.f32.mrb[12].mxu1 }
 0x2fe   :  { %v1418_v9 = vpop.f32.mrb[13].mxu0  ;;  %v1489_v13 = vpop.f32.mrb[13].mxu1 }
 0x2ff   :  { %3859 = vmatpush1.bf16.msra.mxu0 %v5133_v28  ;;  %3891 = vmatpush1.bf16.msra.mxu1 %v5121_v30 }
 0x300   :  { %3861 = vmatprep.subr.bf16.mxu0 %v5122_v46  ;;  %3893 = vmatprep.subr.bf16.mxu1 %v5123_v50 }
 0x303   :  { %3863 = vmatpush1.bf16.msra.mxu0 %v5124_v61  ;;  %3895 = vmatpush1.bf16.msra.mxu1 %v5125_v10 }
 0x304   :  { %3865 = vmatprep.subr.bf16.mxu0 %v5126_v56  ;;  %3897 = vmatprep.subr.bf16.mxu1 %v5127_v45 }
 0x307   :  { %3867 = vmatpush1.bf16.msra.mxu0 %v5128_v23  ;;  %3899 = vmatpush1.bf16.msra.mxu1 %v5129_v6 }
 0x308   :  { %3901 = vmatprep.subr.bf16.mxu0 %v5130_v33  ;;  %3933 = vmatprep.subr.bf16.mxu1 %v5131_v11 }
 0x30a   :  { %2565 = vmatmul.mubr.f32.vlgmr.msra.gmra.mrb[26].mxu0 %v4508_v20  ;;  %2636 = vmatmul.mubr.f32.vlgmr.msra.gmra.mrb[26].mxu1 %v4508_v20 }
 0x30b   :  { %3903 = vmatpush1.bf16.msra.mxu0 %v4368_v12  ;;  %3935 = vmatpush1.bf16.msra.mxu1 %v4372_v14 }
 0x30c   :  { %3905 = vmatprep.subr.bf16.mxu0 %v5154_v17  ;;  %3937 = vmatprep.subr.bf16.mxu1 %v4377_v25 }
 0x30d   :  { %2706 = vmatprep.mubr.f32.mxu0 %v5108_v47  ;;  %2777 = vmatprep.mubr.f32.mxu1 %v5108_v47 }
 0x30f   :  { %3907 = vmatpush1.bf16.msra.mxu0 %v4380_v41  ;;  %3939 = vmatpush1.bf16.msra.mxu1 %v4384_v42 }
 0x310   :  { %3909 = vmatprep.subr.bf16.mxu0 %v5140_v55  ;;  %3941 = vmatprep.subr.bf16.mxu1 %v5155_v18 }
 0x313   :  { %3911 = vmatpush1.bf16.msra.mxu0 %v5156_v22  ;;  %3943 = vmatpush1.bf16.msra.mxu1 %v5157_v26 }
 0x314   :  { %3913 = vmatprep.subr.bf16.mxu0 %v5158_v27  ;;  %3945 = vmatprep.subr.bf16.mxu1 %v5159_v31 }
 0x317   :  { %3915 = vmatpush1.bf16.msra.mxu0 %v5112_v36  ;;  %3947 = vmatpush1.bf16.msra.mxu1 %v5113_v38 }
 0x318   :  { %3917 = vmatprep.subr.bf16.mxu0 %v5114_v21  ;;  %3949 = vmatprep.subr.bf16.mxu1 %v5115_v7 }
 0x31b   :  { %3919 = vmatpush1.bf16.msra.mxu0 %v5138_v43  ;;  %3951 = vmatpush1.bf16.msra.mxu1 %v4422_v19 }
 0x31c   :  { %3921 = vmatprep.subr.bf16.mxu0 %v5160_v35  ;;  %3953 = vmatprep.subr.bf16.mxu1 %v5118_v54 }
 0x31d   :  { %v1597_v39 = vpop.f32.mrb[14].mxu0  ;;  %v1668_v40 = vpop.f32.mrb[14].mxu1 }
 0x31e   :  { %v1599_v44 = vpop.f32.mrb[15].mxu0  ;;  %v1670_v51 = vpop.f32.mrb[15].mxu1 }
 0x31f   :  { %3923 = vmatpush1.bf16.msra.mxu0 %v4432_v58  ;;  %3955 = vmatpush1.bf16.msra.mxu1 %v4436_v0 }
 0x320   :  { %3925 = vmatprep.subr.bf16.mxu0 %v4438_v60  ;;  %3957 = vmatprep.subr.bf16.mxu1 %v4441_v59 }
 0x323   :  { %3927 = vmatpush1.bf16.msra.mxu0 %v4444_v24  ;;  %3959 = vmatpush1.bf16.msra.mxu1 %v4448_v34 }
 0x324   :  { %3929 = vmatprep.subr.bf16.mxu0 %v4450_v32  ;;  %3961 = vmatprep.subr.bf16.mxu1 %v4453_v48 }
 0x327   :  { %3931 = vmatpush1.bf16.msra.mxu0 %v4456_v62  ;;  %3963 = vmatpush1.bf16.msra.mxu1 %v4461_v5 }
 0x32a   :  { %2707 = vmatmul.mubr.f32.vlgmr.msra.gmra.mrb[28].mxu0 %v2499_v53  ;;  %2778 = vmatmul.mubr.f32.vlgmr.msra.gmra.mrb[28].mxu1 %v2499_v53 }
 0x33d   :  { %v1739_v57 = vpop.f32.mrb[16].mxu0  ;;  %v1810_v63 = vpop.f32.mrb[16].mxu1 }
 0x33e   :  { %v1741_v1 = vpop.f32.mrb[17].mxu0  ;;  %v1812_v2 = vpop.f32.mrb[17].mxu1 }
 0x35d   :  { %v1920_v12 = vpop.f32.mrb[18].mxu0  ;;  %v1991_v14 = vpop.f32.mrb[18].mxu1 }
 0x35e   :  { %v1922_v25 = vpop.f32.mrb[19].mxu0  ;;  %v1993_v41 = vpop.f32.mrb[19].mxu1 }
 0x37d   :  { %v2062_v42 = vpop.f32.mrb[20].mxu0  ;;  %v2133_v59 = vpop.f32.mrb[20].mxu1 }
 0x37e   :  { %4083 = shalt.err (!%p4080_p3)
}
 0x37f   :  { %s4084_s5 = scalar_lea.hbm %s5018_s8, 16 }
 0x380   :  { %p4085_p4 = scmp.ne.s32.totalorder %s5018_s8, %s4084_s5  ;;  %p4088_p5 = scmp.lt.u32.totalorder %s4084_s5, %s5018_s8 }
 0x382   :  { %p4090_p6 = pnand %p4088_p5, %p4085_p4 }
 0x384   :  { %4093 = shalt.err (!%p4090_p6)
}
 0x385   :  { %2877 = dma.vmem_to_hbm [thread:$0]  %s2875_s11, 16, %s5018_s8, [#allocation14]   ;;  %v2064_v19 = vpop.f32.mrb[21].mxu0  ;;  %v2135_v24 = vpop.f32.mrb[21].mxu1 }
 0x386   :  { %s4094_s6 = scalar_lea.vmem %s2865_s14, 128  ;;  %p4099_p8 = scmp.lt.s32.totalorder %s2865_s14, %s2865_s14 }
 0x387   :  { %p4095_p7 = scmp.ne.s32.totalorder %s2865_s14, %s4094_s6  ;;  %p4100_p9 = scmp.lt.s32.totalorder %s4094_s6, %s4094_s6 }
 0x389   :  { %p4101_p10 = por %p4100_p9, %p4099_p8 }
 0x38b   :  { %p4102_p11 = pnand %p4101_p10, %p4095_p7 }
 0x38d   :  { %4105 = shalt.err (!%p4102_p11)
}
 0x38e   :  { %s4106_s2 = scalar_lea.hbm %s5017_s7, 128 }
 0x38f   :  { %p4107_p12 = scmp.ne.s32.totalorder %s5017_s7, %s4106_s2  ;;  %p4110_p13 = scmp.lt.u32.totalorder %s4106_s2, %s5017_s7 }
 0x391   :  { %p4112_p0 = pnand %p4110_p13, %p4107_p12 }
 0x393   :  { %4115 = shalt.err (!%p4112_p0)
}
 0x394   :  { %2867 = dma.vmem_to_hbm [thread:$0]  %s2865_s14, 128, %s5017_s7, [#allocation8]  }
 0x395   :  { %s4159_s26 = smov [#allocation15]  }
 0x396   :  { %s2884_s0 = sshll.u32 %s4159_s26, 4  ;;  %s2885_s0 = int_to_ptr.vmem [resolvable:$true] %s2884_s0 }
 0x397   :  { %s4116_s27 = scalar_lea.vmem %s2885_s0, 16  ;;  %s4120_s30 = scalar_lea.vmem %s2885_s0, 32 }
 0x398   :  { %p4117_p1 = scmp.ne.s32.totalorder %s2885_s0, %s4116_s27  ;;  %p4121_p2 = scmp.lt.s32.totalorder %s2885_s0, %s2885_s0 }
 0x399   :  { %p4122_p3 = scmp.lt.s32.totalorder %s4120_s30, %s4116_s27 }
 0x39b   :  { %p4123_p4 = por %p4122_p3, %p4121_p2 }
 0x39d   :  { %p4124_p5 = pnand %p4123_p4, %p4117_p1 }
 0x39f   :  { %4127 = shalt.err (!%p4124_p5)
}
 0x3a0   :  { %s4128_s13 = scalar_lea.hbm %s5019_s9, 16 }
 0x3a1   :  { %p4129_p6 = scmp.ne.s32.totalorder %s5019_s9, %s4128_s13  ;;  %p4132_p7 = scmp.lt.u32.totalorder %s4128_s13, %s5019_s9 }
 0x3a3   :  { %p4134_p8 = pnand %p4132_p7, %p4129_p6 }
 0x3a5   :  { %4137 = shalt.err (!%p4134_p8)
}
 0x3a6   :  { %2887 = dma.vmem_to_hbm [thread:$0]  %s2885_s0, 16, %s5019_s9, [#allocation14]   ;;  %v2243_v58 = vpop.f32.mrb[22].mxu0  ;;  %v2314_v0 = vpop.f32.mrb[22].mxu1 }
 0x3a7   :  { %v2245_v60 = vpop.f32.mrb[23].mxu0  ;;  %v2316_v34 = vpop.f32.mrb[23].mxu1 }
 0x3bd   :  { %v2385_v32 = vpop.f32.mrb[24].mxu0  ;;  %v2456_v48 = vpop.f32.mrb[24].mxu1 }
 0x3be   :  { %v2387_v62 = vpop.f32.mrb[25].mxu0  ;;  %v2458_v5 = vpop.f32.mrb[25].mxu1 }
 0x3dd   :  { %v2566_v47 = vpop.f32.mrb[26].mxu0  ;;  %v2637_v20 = vpop.f32.mrb[26].mxu1 }
 0x3de   :  { %v2568_v36 = vpop.f32.mrb[27].mxu0  ;;  %v2639_v38 = vpop.f32.mrb[27].mxu1 }
 0x3fd   :  { %v2708_v21 = vpop.f32.mrb[28].mxu0  ;;  %v2779_v7 = vpop.f32.mrb[28].mxu1 }
 0x3fe   :  { %v2710_v54 = vpop.f32.mrb[29].mxu0  ;;  %v2781_v33 = vpop.f32.mrb[29].mxu1 }
 0x3ff   :  { %4144 = dma.done.wait [#allocation8], 128  }
 0x400   :  { %4145 = vsyncadd [#allocation8], 4294967168 }
 0x401   :  { %4146 = dma.done.wait [#allocation14], 32  }
 0x402   :  { %4147 = vsyncadd [#allocation14], 4294967264 }
 0x403   :  { %2897 = vsyncpa [#allocation7], 1 }
 0x404   :  { %2898 = vsyncpa [#allocation10], 1 }
 0x405   :  { %2899 = vsyncpa [#allocation8], 1 }
 0x406   :  { %2900 = vsyncpa [#allocation14], 1 }

</bundles_post_ra>
